<compile_context>
chip_gen: v6e
topology: v6e:2x2x1
jax: 0.10.0
libtpu: 0.0.40
codegen_flags: <defaults>
</compile_context>

<pallas_src>
import jax
import jax.numpy as jnp
from jax.experimental import pallas as pl
from jax.experimental.pallas import tpu as pltpu

IN_FEATURES = 28 * 28   # 784
HIDDEN = 512
N_OUT = 10
N_OUT_PAD = 128         # 10 rounded up to a full lane width


def _mlp_kernel(x_ref, w1_ref, b1_ref, w2_ref, b2_ref, w3_ref, b3_ref, o_ref):
    # x: [TB, 784] f32 (cast to bf16 in-kernel), w1: [784, 512] bf16,
    # w2: [512, 512] bf16, w3: [512, 128] bf16, biases: f32 [1, N],
    # output: [TB, 128] bf16 (lane-dense; sliced to 10 outside).
    x = x_ref[...].astype(jnp.bfloat16)      # fused flatten/cast (VPU), no HBM pre-pass

    # Layer 1: Linear(784->512) + ReLU  (bf16 inputs, f32 accumulate on MXU)
    h1 = jnp.dot(x, w1_ref[...], preferred_element_type=jnp.float32)
    h1 = jnp.maximum(h1 + b1_ref[...], 0.0)

    # Layer 2: Linear(512->512) + ReLU
    h2 = jnp.dot(h1.astype(jnp.bfloat16), w2_ref[...],
                 preferred_element_type=jnp.float32)
    h2 = jnp.maximum(h2 + b2_ref[...], 0.0)

    # Layer 3: Linear(512->10, lane-padded to 128) + ReLU
    h3 = jnp.dot(h2.astype(jnp.bfloat16), w3_ref[...],
                 preferred_element_type=jnp.float32)
    h3 = jnp.maximum(h3 + b3_ref[...], 0.0)

    o_ref[...] = h3.astype(o_ref.dtype)


def _round_up(x, m):
    return ((x + m - 1) // m) * m


def _choose_tiling(batch):
    """Balanced batch tiles: target 512 rows/tile; >= 2 tiles when B > 256 so both
    v7x TensorCores are used; TB rounded to 16 (bf16-output sublane packing)."""
    target = 512
    n_tiles = max(1, -(-batch // target))
    if batch > 256:
        n_tiles = max(n_tiles, 2)
    tb = _round_up(-(-batch // n_tiles), 16)
    return tb, n_tiles


@jax.jit
def neural_network_forward(x, params):
    """x: [B, 1, 28, 28] float32 (NCHW). Returns logits [B, 10] float32."""
    w1, b1, w2, b2, w3, b3 = params
    B = x.shape[0]

    # nn.Flatten(): [B, 1, 28, 28] -> [B, 784]; layout-preserving reshape (no copy).
    x2d = x.reshape(B, IN_FEATURES)

    TB, n_tiles = _choose_tiling(B)
    B_pad = TB * n_tiles
    if B_pad != B:
        x2d = jnp.pad(x2d, ((0, B_pad - B), (0, 0)))
    grid = (n_tiles,)

    resident = lambda shape: pl.BlockSpec(shape, lambda i: (0, 0))  # VMEM-resident

    weight_bytes = (IN_FEATURES * HIDDEN + HIDDEN * HIDDEN + HIDDEN * N_OUT_PAD) * 2
    cost = pl.CostEstimate(
        flops=2 * B_pad * (IN_FEATURES * HIDDEN + HIDDEN * HIDDEN + HIDDEN * N_OUT_PAD),
        transcendentals=0,
        bytes_accessed=(B_pad * IN_FEATURES * 4            # x (f32)
                        + weight_bytes                      # weights (bf16)
                        + (HIDDEN + HIDDEN + N_OUT_PAD) * 4  # biases (f32)
                        + B_pad * N_OUT_PAD * 2),           # out (bf16)
    )

    out = pl.pallas_call(
        _mlp_kernel,
        out_shape=jax.ShapeDtypeStruct((B_pad, N_OUT_PAD), jnp.bfloat16),
        grid=grid,
        in_specs=[
            pl.BlockSpec((TB, IN_FEATURES), lambda i: (i, 0)),  # x tile, batch-indexed
            resident(w1.shape),
            resident(b1.shape),
            resident(w2.shape),
            resident(b2.shape),
            resident(w3.shape),
            resident(b3.shape),
        ],
        out_specs=pl.BlockSpec((TB, N_OUT_PAD), lambda i: (i, 0)),
        compiler_params=pltpu.CompilerParams(
            dimension_semantics=("parallel",),   # v7x: shard batch tiles across both TCs
            vmem_limit_bytes=32 << 20,           # TB=512 tiles + f32 temps fit easily
        ),
        cost_estimate=cost,
    )(x2d, w1, b1, w2, b2, w3, b3)

    # Drop batch padding and the 118 zero lanes of the last layer; return f32 logits.
    return out[:B, :N_OUT].astype(jnp.float32)


def init_params(key):
    """Deterministic init mimicking PyTorch nn.Linear default (uniform +-1/sqrt(fan_in)).
    Weights stored transposed vs PyTorch ([in, out]) and cast to bf16; only the last
    layer's output dim is zero-padded (10 -> 128) for lane-dense stores."""
    def linear(key, fan_in, fan_out, n_pad=None):
        kw, kb = jax.random.split(key)
        bound = 1.0 / (fan_in ** 0.5)
        w = jax.random.uniform(kw, (fan_in, fan_out), jnp.float32, -bound, bound)
        b = jax.random.uniform(kb, (1, fan_out), jnp.float32, -bound, bound)
        if n_pad is not None and n_pad > fan_out:
            w = jnp.pad(w, ((0, 0), (0, n_pad - fan_out)))
            b = jnp.pad(b, ((0, 0), (0, n_pad - fan_out)))
        return w.astype(jnp.bfloat16), b  # bf16 weights, f32 biases

    k1, k2, k3 = jax.random.split(key, 3)
    w1, b1 = linear(k1, IN_FEATURES, HIDDEN)
    w2, b2 = linear(k2, HIDDEN, HIDDEN)
    w3, b3 = linear(k3, HIDDEN, N_OUT, n_pad=N_OUT_PAD)
    return (w1, b1, w2, b2, w3, b3)


def _reference(x, params):
    """Pure-JAX reference with the exact same numerics (bf16 inputs, f32 accumulate,
    bf16 output store)."""
    w1, b1, w2, b2, w3, b3 = params
    h = x.reshape(x.shape[0], -1).astype(jnp.bfloat16)
    h = jnp.maximum(jnp.dot(h, w1, preferred_element_type=jnp.float32) + b1, 0.0)
    h = jnp.maximum(jnp.dot(h.astype(jnp.bfloat16), w2,
                            preferred_element_type=jnp.float32) + b2, 0.0)
    h = jnp.maximum(jnp.dot(h.astype(jnp.bfloat16), w3,
                            preferred_element_type=jnp.float32) + b3, 0.0)
    return h.astype(jnp.bfloat16).astype(jnp.float32)[:, :N_OUT]


if __name__ == "__main__":
    key = jax.random.PRNGKey(0)
    kx, kp = jax.random.split(key)

    B = 8  # small batch
    x = jax.random.normal(kx, (B, 1, 28, 28), jnp.float32)  # NCHW Fashion-MNIST shape
    params = init_params(kp)

    logits = neural_network_forward(x, params)
    logits = jax.block_until_ready(logits)

    ref = _reference(x, params)
    assert logits.shape == (B, 10)
    assert jnp.allclose(logits, ref, atol=3e-2, rtol=3e-2), (
        float(jnp.max(jnp.abs(logits - ref))))

    # NOTE: the final ReLU on the logits matches the original PyTorch module exactly
    # (it is part of the given nn.Sequential, even if unusual before a softmax).
    print("KERNEL_OK")
</pallas_src>

<mosaic_0001>
module attributes {stable_mosaic.version = 11 : i64} {
  func.func @_mlp_kernel(%arg0: i32, %arg1: memref<16x784xf32, #tpu.memory_space<vmem>>, %arg2: memref<784x512xbf16, #tpu.memory_space<vmem>>, %arg3: memref<1x512xf32, #tpu.memory_space<vmem>>, %arg4: memref<512x512xbf16, #tpu.memory_space<vmem>>, %arg5: memref<1x512xf32, #tpu.memory_space<vmem>>, %arg6: memref<512x128xbf16, #tpu.memory_space<vmem>>, %arg7: memref<1x128xf32, #tpu.memory_space<vmem>>, %arg8: memref<16x128xbf16, #tpu.memory_space<vmem>>) attributes {dimension_semantics = [#tpu.dimension_semantics<parallel>], iteration_bounds = array<i64: 1>, scalar_prefetch = 0 : i64, scratch_operands = 0 : i64, tpu.core_type = #tpu.core_type<tc>, window_params = [{transform_indices = @transform_0, window_bounds = array<i64: 16, 784>}, {pipeline_mode = #tpu.pipeline_mode<synchronous>, transform_indices = @transform_1, window_bounds = array<i64: 784, 512>}, {pipeline_mode = #tpu.pipeline_mode<synchronous>, transform_indices = @transform_2, window_bounds = array<i64: 1, 512>}, {pipeline_mode = #tpu.pipeline_mode<synchronous>, transform_indices = @transform_3, window_bounds = array<i64: 512, 512>}, {pipeline_mode = #tpu.pipeline_mode<synchronous>, transform_indices = @transform_4, window_bounds = array<i64: 1, 512>}, {pipeline_mode = #tpu.pipeline_mode<synchronous>, transform_indices = @transform_5, window_bounds = array<i64: 512, 128>}, {pipeline_mode = #tpu.pipeline_mode<synchronous>, transform_indices = @transform_6, window_bounds = array<i64: 1, 128>}, {transform_indices = @transform_7, window_bounds = array<i64: 16, 128>}]} {
    %c0 = arith.constant 0 : index
    %c0_0 = arith.constant 0 : index
    %0 = vector.load %arg1[%c0, %c0_0] : memref<16x784xf32, #tpu.memory_space<vmem>>, vector<16x784xf32>
    %1 = arith.truncf %0 : vector<16x784xf32> to vector<16x784xbf16>
    %c0_1 = arith.constant 0 : index
    %c0_2 = arith.constant 0 : index
    %2 = vector.load %arg2[%c0_1, %c0_2] : memref<784x512xbf16, #tpu.memory_space<vmem>>, vector<784x512xbf16>
    %cst = arith.constant dense<0.000000e+00> : vector<16x512xf32>
    %3 = tpu.matmul %1, %2, %cst {dimension_numbers = #tpu.dot_dimension_numbers<[1], [0], [0], [1], [0, 0, 1, 1], [], []>} : vector<16x784xbf16>, vector<784x512xbf16>, vector<16x512xf32> -> vector<16x512xf32>
    %c0_3 = arith.constant 0 : index
    %c0_4 = arith.constant 0 : index
    %4 = vector.load %arg3[%c0_3, %c0_4] : memref<1x512xf32, #tpu.memory_space<vmem>>, vector<1x512xf32>
    %5 = vector.broadcast %4 : vector<1x512xf32> to vector<16x512xf32>
    %6 = arith.addf %3, %5 : vector<16x512xf32>
    %cst_5 = arith.constant 0.000000e+00 : f32
    %7 = vector.broadcast %cst_5 : f32 to vector<16x512xf32>
    %8 = arith.maximumf %6, %7 : vector<16x512xf32>
    %9 = arith.truncf %8 : vector<16x512xf32> to vector<16x512xbf16>
    %c0_6 = arith.constant 0 : index
    %c0_7 = arith.constant 0 : index
    %10 = vector.load %arg4[%c0_6, %c0_7] : memref<512x512xbf16, #tpu.memory_space<vmem>>, vector<512x512xbf16>
    %cst_8 = arith.constant dense<0.000000e+00> : vector<16x512xf32>
    %11 = tpu.matmul %9, %10, %cst_8 {dimension_numbers = #tpu.dot_dimension_numbers<[1], [0], [0], [1], [0, 0, 1, 1], [], []>} : vector<16x512xbf16>, vector<512x512xbf16>, vector<16x512xf32> -> vector<16x512xf32>
    %c0_9 = arith.constant 0 : index
    %c0_10 = arith.constant 0 : index
    %12 = vector.load %arg5[%c0_9, %c0_10] : memref<1x512xf32, #tpu.memory_space<vmem>>, vector<1x512xf32>
    %13 = vector.broadcast %12 : vector<1x512xf32> to vector<16x512xf32>
    %14 = arith.addf %11, %13 : vector<16x512xf32>
    %cst_11 = arith.constant 0.000000e+00 : f32
    %15 = vector.broadcast %cst_11 : f32 to vector<16x512xf32>
    %16 = arith.maximumf %14, %15 : vector<16x512xf32>
    %17 = arith.truncf %16 : vector<16x512xf32> to vector<16x512xbf16>
    %c0_12 = arith.constant 0 : index
    %c0_13 = arith.constant 0 : index
    %18 = vector.load %arg6[%c0_12, %c0_13] : memref<512x128xbf16, #tpu.memory_space<vmem>>, vector<512x128xbf16>
    %cst_14 = arith.constant dense<0.000000e+00> : vector<16x128xf32>
    %19 = tpu.matmul %17, %18, %cst_14 {dimension_numbers = #tpu.dot_dimension_numbers<[1], [0], [0], [1], [0, 0, 1, 1], [], []>} : vector<16x512xbf16>, vector<512x128xbf16>, vector<16x128xf32> -> vector<16x128xf32>
    %c0_15 = arith.constant 0 : index
    %c0_16 = arith.constant 0 : index
    %20 = vector.load %arg7[%c0_15, %c0_16] : memref<1x128xf32, #tpu.memory_space<vmem>>, vector<1x128xf32>
    %21 = vector.broadcast %20 : vector<1x128xf32> to vector<16x128xf32>
    %22 = arith.addf %19, %21 : vector<16x128xf32>
    %cst_17 = arith.constant 0.000000e+00 : f32
    %23 = vector.broadcast %cst_17 : f32 to vector<16x128xf32>
    %24 = arith.maximumf %22, %23 : vector<16x128xf32>
    %25 = arith.truncf %24 : vector<16x128xf32> to vector<16x128xbf16>
    %c0_18 = arith.constant 0 : index
    %c0_19 = arith.constant 0 : index
    %26 = vector.load %arg8[%c0_18, %c0_19] : memref<16x128xbf16, #tpu.memory_space<vmem>>, vector<16x128xbf16>
    tpu.vector_store %arg8[%c0_18, %c0_19], %25 {strides = array<i32>} : memref<16x128xbf16, #tpu.memory_space<vmem>>, vector<16x128xbf16>,
    return
  }
  func.func @transform_0(%arg0: i32) -> (i32, i32) {
    %c0_i32 = arith.constant 0 : i32
    %c0_i32_0 = arith.constant 0 : i32
    return %arg0, %c0_i32 : i32, i32
  }
  func.func @transform_1(%arg0: i32) -> (i32, i32) {
    %c0_i32 = arith.constant 0 : i32
    %c0_i32_0 = arith.constant 0 : i32
    %c0_i32_1 = arith.constant 0 : i32
    return %c0_i32, %c0_i32_0 : i32, i32
  }
  func.func @transform_2(%arg0: i32) -> (i32, i32) {
    %c0_i32 = arith.constant 0 : i32
    %c0_i32_0 = arith.constant 0 : i32
    %c0_i32_1 = arith.constant 0 : i32
    return %c0_i32, %c0_i32_0 : i32, i32
  }
  func.func @transform_3(%arg0: i32) -> (i32, i32) {
    %c0_i32 = arith.constant 0 : i32
    %c0_i32_0 = arith.constant 0 : i32
    %c0_i32_1 = arith.constant 0 : i32
    return %c0_i32, %c0_i32_0 : i32, i32
  }
  func.func @transform_4(%arg0: i32) -> (i32, i32) {
    %c0_i32 = arith.constant 0 : i32
    %c0_i32_0 = arith.constant 0 : i32
    %c0_i32_1 = arith.constant 0 : i32
    return %c0_i32, %c0_i32_0 : i32, i32
  }
  func.func @transform_5(%arg0: i32) -> (i32, i32) {
    %c0_i32 = arith.constant 0 : i32
    %c0_i32_0 = arith.constant 0 : i32
    %c0_i32_1 = arith.constant 0 : i32
    return %c0_i32, %c0_i32_0 : i32, i32
  }
  func.func @transform_6(%arg0: i32) -> (i32, i32) {
    %c0_i32 = arith.constant 0 : i32
    %c0_i32_0 = arith.constant 0 : i32
    %c0_i32_1 = arith.constant 0 : i32
    return %c0_i32, %c0_i32_0 : i32, i32
  }
  func.func @transform_7(%arg0: i32) -> (i32, i32) {
    %c0_i32 = arith.constant 0 : i32
    %c0_i32_0 = arith.constant 0 : i32
    return %arg0, %c0_i32 : i32, i32
  }
}

</mosaic_0001>

<bundles_post_ra>
// kernel: neural_network_forward.1
= control target key start
LH: loop header
LB: loop body
LE: loop exit
PB: predicated region body
PF: predicated region fallthrough
CT: control target
= control target key end

     0   :  { %12 = vsyncpa [#allocation3], 0  ;;  %s4219_s0 = inlined_call_operand.vmem [shape: f32[16,784], index: 0, kind: input, shape index: {}]   ;;  %s4220_s1 = inlined_call_operand.hbm [shape: bf16[784,512], index: 1, kind: input, shape index: {}]   ;;  %s4221_s2 = inlined_call_operand.vmem [shape: f32[1,512], index: 2, kind: input, shape index: {}]   ;;  %s4222_s3 = inlined_call_operand.hbm [shape: bf16[512,512], index: 3, kind: input, shape index: {}]   ;;  %s4223_s4 = inlined_call_operand.vmem [shape: f32[1,512], index: 4, kind: input, shape index: {}]   ;;  %s4224_s5 = inlined_call_operand.vmem [shape: bf16[512,128], index: 5, kind: input, shape index: {}]   ;;  %s4225_s6 = inlined_call_operand.vmem [shape: f32[1,128], index: 6, kind: input, shape index: {}]   ;;  %s4226_s7 = inlined_call_operand.vmem [shape: bf16[16,128], index: 7, kind: output, shape index: {}]  }
   0x1   :  { %13 = vsyncpa [#allocation5], 0  ;;  %s3950_s24 = smov [#allocation2]  }
   0x2   :  { %s21_s25 = sshll.u32 %s3950_s24, 4  ;;  %s22_s25 = int_to_ptr.vmem [resolvable:$true] %s21_s25 }
   0x3   :  { %s3914_s26 = scalar_lea.vmem %s22_s25, 25088  ;;  %p3919_p1 = scmp.lt.s32.totalorder %s22_s25, %s22_s25 }
   0x4   :  { %p3915_p0 = scmp.ne.s32.totalorder %s22_s25, %s3914_s26  ;;  %p3920_p2 = scmp.lt.s32.totalorder %s3914_s26, %s3914_s26 }
   0x6   :  { %p3921_p3 = por %p3920_p2, %p3919_p1 }
   0x8   :  { %p3922_p4 = pnand %p3921_p3, %p3915_p0 }
   0xa   :  { %3925 = shalt.err (!%p3922_p4)
}
   0xb   :  { %s3951_s27 = smov 256   ;;  %s3952_s28 = smov 16  }
   0xc   :  { %27 = dma.hbm_to_vmem [thread:$0]  %s4220_s1, 25088, %s22_s25, [#allocation3], %s3951_s27, %s3951_s27, %s3952_s28  }
   0xd   :  { %s3953_s8 = smov [#allocation4]  }
   0xe   :  { %s35_s9 = sshll.u32 %s3953_s8, 4  ;;  %s36_s9 = int_to_ptr.vmem [resolvable:$true] %s35_s9 }
   0xf   :  { %s3934_s10 = scalar_lea.vmem %s36_s9, 16384  ;;  %p3939_p6 = scmp.lt.s32.totalorder %s36_s9, %s36_s9 }
  0x10   :  { %p3935_p5 = scmp.ne.s32.totalorder %s36_s9, %s3934_s10  ;;  %p3940_p7 = scmp.lt.s32.totalorder %s3934_s10, %s3934_s10 }
  0x12   :  { %p3941_p8 = por %p3940_p7, %p3939_p6 }
  0x14   :  { %p3942_p9 = pnand %p3941_p8, %p3935_p5 }
  0x16   :  { %3945 = shalt.err (!%p3942_p9)
}
  0x17   :  { %41 = dma.hbm_to_vmem [thread:$0]  %s4222_s3, 16384, %s36_s9, [#allocation5], %s3951_s27, %s3951_s27, %s3952_s28  }
  0x18   :  { %3946 = dma.done.wait [#allocation3], 25088  }
  0x19   :  { %3947 = vsyncadd [#allocation3], 4294942208 }
  0x1a   :  { %3948 = dma.done.wait [#allocation5], 16384  }
  0x1b   :  { %3949 = vsyncadd [#allocation5], 4294950912  ;;  %v3388_v0 = vld [vmem:[#allocation2 + $0xe4] ss:$16 sps:$4 sm:$0xff]   ;;  %v3392_v2 = vld [vmem:[#allocation2 + $0xe0] ss:$16 sps:$4 sm:$0xff]  }
  0x1c   :  { %v3390_v1 = vld [vmem:[#allocation2 + $0x2e4] ss:$16 sps:$4 sm:$0xff]   ;;  %1278 = vmatprep.subr.bf16.mxu0 %v3388_v0  ;;  %v3393_v3 = vld [vmem:[#allocation2 + $0x2e0] ss:$16 sps:$4 sm:$0xff]   ;;  %v56_v46 = vld [vmem:[%s4219_s0 + $0x8] sm:$0xff]  ;;  %vm1274_vm0 = vcmask 130048  }
  0x1d   :  { %1321 = vmatprep.subr.bf16.mxu1 %v3390_v1  ;;  %v3394_v4 = vld [vmem:[#allocation2 + $0xc4] ss:$16 sps:$4 sm:$0xff]   ;;  %1279 = vmatpush1.bf16.msra.mxu0 %v3392_v2  ;;  %v3398_v6 = vld [vmem:[#allocation2 + $0xc0] ss:$16 sps:$4 sm:$0xff]   ;;  %v58_v48 = vld [vmem:[%s4219_s0 + $0x18] sm:$0xff] }
  0x1e   :  { %1322 = vmatpush1.bf16.msra.mxu1 %v3393_v3  ;;  %v3396_v5 = vld [vmem:[#allocation2 + $0x2c4] ss:$16 sps:$4 sm:$0xff]   ;;  %1280 = vmatprep.subr.bf16.mxu0 %v3394_v4  ;;  %v3399_v7 = vld [vmem:[#allocation2 + $0x2c0] ss:$16 sps:$4 sm:$0xff]  }
  0x1f   :  { %1323 = vmatprep.subr.bf16.mxu1 %v3396_v5  ;;  %v3400_v8 = vld [vmem:[#allocation2 + $0xa4] ss:$16 sps:$4 sm:$0xff]   ;;  %v3404_v10 = vld [vmem:[#allocation2 + $0xa0] ss:$16 sps:$4 sm:$0xff]  }
  0x20   :  { %v3402_v9 = vld [vmem:[#allocation2 + $0x2a4] ss:$16 sps:$4 sm:$0xff]   ;;  %v3405_v11 = vld [vmem:[#allocation2 + $0x2a0] ss:$16 sps:$4 sm:$0xff]  }
  0x21   :  { %1281 = vmatpush1.bf16.msra.mxu0 %v3398_v6  ;;  %v3406_v12 = vld [vmem:[#allocation2 + $0x84] ss:$16 sps:$4 sm:$0xff]   ;;  %v3410_v14 = vld [vmem:[#allocation2 + $0x80] ss:$16 sps:$4 sm:$0xff]  }
  0x22   :  { %1324 = vmatpush1.bf16.msra.mxu1 %v3399_v7  ;;  %1282 = vmatprep.subr.bf16.mxu0 %v3400_v8  ;;  %v3408_v13 = vld [vmem:[#allocation2 + $0x284] ss:$16 sps:$4 sm:$0xff]   ;;  %v3411_v15 = vld [vmem:[#allocation2 + $0x280] ss:$16 sps:$4 sm:$0xff]   ;;  %v62_v7 = vld [vmem:[%s4219_s0 + $0x38] sm:$0xff] }
  0x23   :  { %1325 = vmatprep.subr.bf16.mxu1 %v3402_v9  ;;  %v3412_v16 = vld [vmem:[#allocation2 + $0x64] ss:$16 sps:$4 sm:$0xff]   ;;  %v3416_v18 = vld [vmem:[#allocation2 + $0x60] ss:$16 sps:$4 sm:$0xff]   ;;  %v64_v9 = vld [vmem:[%s4219_s0 + $0x48] sm:$0xff] }
  0x24   :  { %v3414_v17 = vld [vmem:[#allocation2 + $0x264] ss:$16 sps:$4 sm:$0xff]   ;;  %v3417_v19 = vld [vmem:[#allocation2 + $0x260] ss:$16 sps:$4 sm:$0xff]  }
  0x25   :  { %1283 = vmatpush1.bf16.msra.mxu0 %v3404_v10  ;;  %v3418_v20 = vld [vmem:[#allocation2 + $0x44] ss:$16 sps:$4 sm:$0xff]   ;;  %v3422_v22 = vld [vmem:[#allocation2 + $0x40] ss:$16 sps:$4 sm:$0xff]  }
  0x26   :  { %1326 = vmatpush1.bf16.msra.mxu1 %v3405_v11  ;;  %1284 = vmatprep.subr.bf16.mxu0 %v3406_v12  ;;  %v3420_v21 = vld [vmem:[#allocation2 + $0x244] ss:$16 sps:$4 sm:$0xff]   ;;  %v3423_v23 = vld [vmem:[#allocation2 + $0x240] ss:$16 sps:$4 sm:$0xff]  }
  0x27   :  { %1327 = vmatprep.subr.bf16.mxu1 %v3408_v13  ;;  %v3424_v24 = vld [vmem:[#allocation2 + $0x24] ss:$16 sps:$4 sm:$0xff]   ;;  %v3428_v26 = vld [vmem:[#allocation2 + $0x20] ss:$16 sps:$4 sm:$0xff]  }
  0x28   :  { %v3426_v25 = vld [vmem:[#allocation2 + $0x224] ss:$16 sps:$4 sm:$0xff]   ;;  %v3429_v27 = vld [vmem:[#allocation2 + $0x220] ss:$16 sps:$4 sm:$0xff]  }
  0x29   :  { %1285 = vmatpush1.bf16.msra.mxu0 %v3410_v14  ;;  %v3430_v28 = vld [vmem:[#allocation2 + $0x4] ss:$16 sps:$4 sm:$0xff]   ;;  %v3434_v30 = vld [vmem:[#allocation2] ss:$16 sps:$4 sm:$0xff]  }
  0x2a   :  { %1328 = vmatpush1.bf16.msra.mxu1 %v3411_v15  ;;  %1286 = vmatprep.subr.bf16.mxu0 %v3412_v16  ;;  %v3432_v29 = vld [vmem:[#allocation2 + $0x204] ss:$16 sps:$4 sm:$0xff]   ;;  %v3435_v31 = vld [vmem:[#allocation2 + $0x200] ss:$16 sps:$4 sm:$0xff]  }
  0x2b   :  { %1329 = vmatprep.subr.bf16.mxu1 %v3414_v17  ;;  %v3436_v32 = vld [vmem:[#allocation2 + $0x1e4] ss:$16 sps:$4 sm:$0xff]   ;;  %v3440_v34 = vld [vmem:[#allocation2 + $0x1e0] ss:$16 sps:$4 sm:$0xff]   ;;  %v3495_v17 = vld [vmem:[#allocation2 + $0xec] ss:$16 sps:$4 sm:$0xff]  }
  0x2c   :  { %v3438_v33 = vld [vmem:[#allocation2 + $0x3e4] ss:$16 sps:$4 sm:$0xff]   ;;  %v3441_v35 = vld [vmem:[#allocation2 + $0x3e0] ss:$16 sps:$4 sm:$0xff]  }
  0x2d   :  { %1287 = vmatpush1.bf16.msra.mxu0 %v3416_v18  ;;  %v3442_v36 = vld [vmem:[#allocation2 + $0x1c4] ss:$16 sps:$4 sm:$0xff]   ;;  %v3446_v38 = vld [vmem:[#allocation2 + $0x1c0] ss:$16 sps:$4 sm:$0xff]  }
  0x2e   :  { %1330 = vmatpush1.bf16.msra.mxu1 %v3417_v19  ;;  %1288 = vmatprep.subr.bf16.mxu0 %v3418_v20  ;;  %v3444_v37 = vld [vmem:[#allocation2 + $0x3c4] ss:$16 sps:$4 sm:$0xff]   ;;  %v3447_v39 = vld [vmem:[#allocation2 + $0x3c0] ss:$16 sps:$4 sm:$0xff]   ;;  %v68_v20 = vld [vmem:[%s4219_s0 + $0x68] sm:$0xff] }
  0x2f   :  { %1331 = vmatprep.subr.bf16.mxu1 %v3420_v21  ;;  %v3448_v40 = vld [vmem:[#allocation2 + $0x1a4] ss:$16 sps:$4 sm:$0xff]   ;;  %v3452_v42 = vld [vmem:[#allocation2 + $0x1a0] ss:$16 sps:$4 sm:$0xff]   ;;  %v3954_v21 = vmov 0  }
  0x30   :  { %v3450_v41 = vld [vmem:[#allocation2 + $0x3a4] ss:$16 sps:$4 sm:$0xff]   ;;  %v3453_v43 = vld [vmem:[#allocation2 + $0x3a0] ss:$16 sps:$4 sm:$0xff]  }
  0x31   :  { %1289 = vmatpush1.bf16.msra.mxu0 %v3422_v22  ;;  %v3454_v44 = vld [vmem:[#allocation2 + $0x184] ss:$16 sps:$4 sm:$0xff]   ;;  %v3458_v50 = vld [vmem:[#allocation2 + $0x180] ss:$16 sps:$4 sm:$0xff]  }
  0x32   :  { %1332 = vmatpush1.bf16.msra.mxu1 %v3423_v23  ;;  %1290 = vmatprep.subr.bf16.mxu0 %v3424_v24  ;;  %v3456_v45 = vld [vmem:[#allocation2 + $0x384] ss:$16 sps:$4 sm:$0xff]   ;;  %v3459_v51 = vld [vmem:[#allocation2 + $0x380] ss:$16 sps:$4 sm:$0xff]   ;;  %v3493_v24 = vld [vmem:[#allocation2 + $0xe8] ss:$16 sps:$4 sm:$0xff]  }
  0x33   :  { %1333 = vmatprep.subr.bf16.mxu1 %v3426_v25  ;;  %v63_v47 = vld [vmem:[%s4219_s0 + $0x40] sm:$0xff]  ;;  %v65_v49 = vld [vmem:[%s4219_s0 + $0x50] sm:$0xff] }
  0x34   :  { %v3460_v52 = vld [vmem:[#allocation2 + $0x164] ss:$16 sps:$4 sm:$0xff]   ;;  %v4013_v53 = vpack.c.bf16 %v63_v47, %v56_v46  ;;  %v4015_v54 = vpack.c.bf16 %v65_v49, %v58_v48  ;;  %v3464_v56 = vld [vmem:[#allocation2 + $0x160] ss:$16 sps:$4 sm:$0xff]   ;;  %v3523_v47 = vld [vmem:[#allocation2 + $0x48] ss:$16 sps:$4 sm:$0xff]  }
  0x35   :  { %1291 = vmatpush1.bf16.msra.mxu0 %v3428_v26  ;;  %v3462_v55 = vld [vmem:[#allocation2 + $0x364] ss:$16 sps:$4 sm:$0xff]   ;;  %v3465_v57 = vld [vmem:[#allocation2 + $0x360] ss:$16 sps:$4 sm:$0xff]   ;;  %v3501_v26 = vld [vmem:[#allocation2 + $0xcc] ss:$16 sps:$4 sm:$0xff]  }
  0x36   :  { %1334 = vmatpush1.bf16.msra.mxu1 %v3429_v27  ;;  %1292 = vmatprep.subr.bf16.mxu0 %v3430_v28  ;;  %v3466_v58 = vld [vmem:[#allocation2 + $0x144] ss:$16 sps:$4 sm:$0xff]   ;;  %v3470_v60 = vld [vmem:[#allocation2 + $0x140] ss:$16 sps:$4 sm:$0xff]   ;;  %v3499_v28 = vld [vmem:[#allocation2 + $0xc8] ss:$16 sps:$4 sm:$0xff]  }
  0x37   :  { %1335 = vmatprep.subr.bf16.mxu1 %v3432_v29  ;;  %1310 = vmatprep.mubr.bf16.mxu0 %v4013_v53  ;;  %v3468_v59 = vld [vmem:[#allocation2 + $0x344] ss:$16 sps:$4 sm:$0xff]   ;;  %v3471_v61 = vld [vmem:[#allocation2 + $0x340] ss:$16 sps:$4 sm:$0xff]   ;;  %v3531_v49 = vld [vmem:[#allocation2 + $0x2c] ss:$16 sps:$4 sm:$0xff]  }
  0x38   :  { %1353 = vmatprep.mubr.bf16.mxu1 %v4015_v54  ;;  %v3472_v62 = vld [vmem:[#allocation2 + $0x124] ss:$16 sps:$4 sm:$0xff]   ;;  %v3476_v0 = vld [vmem:[#allocation2 + $0x120] ss:$16 sps:$4 sm:$0xff]  }
  0x39   :  { %1293 = vmatpush1.bf16.msra.mxu0 %v3434_v30  ;;  %v3474_v63 = vld [vmem:[#allocation2 + $0x324] ss:$16 sps:$4 sm:$0xff]   ;;  %v3477_v1 = vld [vmem:[#allocation2 + $0x320] ss:$16 sps:$4 sm:$0xff]   ;;  %v3507_v30 = vld [vmem:[#allocation2 + $0xac] ss:$16 sps:$4 sm:$0xff]  }
  0x3a   :  { %1336 = vmatpush1.bf16.msra.mxu1 %v3435_v31  ;;  %1294 = vmatprep.subr.bf16.mxu0 %v3436_v32  ;;  %v3478_v2 = vld [vmem:[#allocation2 + $0x104] ss:$16 sps:$4 sm:$0xff]   ;;  %v3482_v4 = vld [vmem:[#allocation2 + $0x100] ss:$16 sps:$4 sm:$0xff]   ;;  %v3505_v32 = vld [vmem:[#allocation2 + $0xa8] ss:$16 sps:$4 sm:$0xff]  }
  0x3b   :  { %1337 = vmatprep.subr.bf16.mxu1 %v3438_v33  ;;  %v3480_v3 = vld [vmem:[#allocation2 + $0x304] ss:$16 sps:$4 sm:$0xff]   ;;  %v3483_v5 = vld [vmem:[#allocation2 + $0x300] ss:$16 sps:$4 sm:$0xff]  }
  0x3c   :  { %v55_v6 = vld [vmem:[%s4219_s0] sm:$0xff]  ;;  %v57_v8 = vld [vmem:[%s4219_s0 + $0x10] sm:$0xff] }
  0x3d   :  { %1295 = vmatpush2.bf16.msra.mxu0 %v3440_v34  ;;  %v3486_v10 = vld [vmem:[#allocation2 + $0x4e4] ss:$16 sps:$4 sm:$0xff]   ;;  %v4031_v12 = vpack.c.bf16 %v62_v7, %v55_v6  ;;  %v4033_v13 = vpack.c.bf16 %v64_v9, %v57_v8  ;;  %v3484_v14 = vld [vmem:[#allocation2 + $0x4e0] ss:$16 sps:$4 sm:$0xff]   ;;  %v3513_v34 = vld [vmem:[#allocation2 + $0x8c] ss:$16 sps:$4 sm:$0xff]  }
  0x3e   :  { %1338 = vmatpush2.bf16.msra.mxu1 %v3441_v35  ;;  %1296 = vmatprep.subr.bf16.mxu0 %v3442_v36  ;;  %v3489_v11 = vld [vmem:[#allocation2 + $0x604] ss:$16 sps:$4 sm:$0xff]   ;;  %v3487_v15 = vld [vmem:[#allocation2 + $0x600] ss:$16 sps:$4 sm:$0xff]   ;;  %v3511_v36 = vld [vmem:[#allocation2 + $0x88] ss:$16 sps:$4 sm:$0xff]  }
  0x3f   :  { %1339 = vmatprep.subr.bf16.mxu1 %v3444_v37  ;;  %v3492_v16 = vld [vmem:[#allocation2 + $0x4c4] ss:$16 sps:$4 sm:$0xff]   ;;  %v3490_v18 = vld [vmem:[#allocation2 + $0x4c0] ss:$16 sps:$4 sm:$0xff]   ;;  %v3561_v6 = vld [vmem:[#allocation2 + $0x18c] ss:$16 sps:$4 sm:$0xff]  }
  0x40   :  { %v61_v19 = vld [vmem:[%s4219_s0 + $0x30] sm:$0xff]  ;;  %v3559_v8 = vld [vmem:[#allocation2 + $0x188] ss:$16 sps:$4 sm:$0xff]  }
  0x41   :  { %1297 = vmatpush2.bf16.msra.mxu0 %v3446_v38  ;;  %v3498_v22 = vld [vmem:[#allocation2 + $0x4a4] ss:$16 sps:$4 sm:$0xff]   ;;  %v4044_v23 = vpack.c.bf16 %v68_v20, %v61_v19  ;;  %v3496_v25 = vld [vmem:[#allocation2 + $0x4a0] ss:$16 sps:$4 sm:$0xff]   ;;  %v3519_v38 = vld [vmem:[#allocation2 + $0x6c] ss:$16 sps:$4 sm:$0xff]  }
  0x42   :  { %1340 = vmatpush2.bf16.msra.mxu1 %v3447_v39  ;;  %1298 = vmatprep.subr.bf16.mxu0 %v3448_v40  ;;  %v3504_v27 = vld [vmem:[#allocation2 + $0x484] ss:$16 sps:$4 sm:$0xff]   ;;  %v3502_v29 = vld [vmem:[#allocation2 + $0x480] ss:$16 sps:$4 sm:$0xff]   ;;  %v3517_v40 = vld [vmem:[#allocation2 + $0x68] ss:$16 sps:$4 sm:$0xff]  }
  0x43   :  { %1341 = vmatprep.subr.bf16.mxu1 %v3450_v41  ;;  %v3510_v31 = vld [vmem:[#allocation2 + $0x464] ss:$16 sps:$4 sm:$0xff]   ;;  %v3508_v33 = vld [vmem:[#allocation2 + $0x460] ss:$16 sps:$4 sm:$0xff]   ;;  %v60_v41 = vld [vmem:[%s4219_s0 + $0x28] sm:$0xff] }
  0x44   :  { %v3516_v35 = vld [vmem:[#allocation2 + $0x444] ss:$16 sps:$4 sm:$0xff]   ;;  %v3514_v37 = vld [vmem:[#allocation2 + $0x440] ss:$16 sps:$4 sm:$0xff]  }
  0x45   :  { %1299 = vmatpush2.bf16.msra.mxu0 %v3452_v42  ;;  %v3522_v39 = vld [vmem:[#allocation2 + $0x424] ss:$16 sps:$4 sm:$0xff]   ;;  %v3526_v48 = vld [vmem:[#allocation2 + $0x400] ss:$16 sps:$4 sm:$0xff]  }
  0x46   :  { %1342 = vmatpush2.bf16.msra.mxu1 %v3453_v43  ;;  %1300 = vmatprep.subr.bf16.mxu0 %v3454_v44  ;;  %v67_v42 = vld [vmem:[%s4219_s0 + $0x60] sm:$0xff] }
  0x47   :  { %1343 = vmatprep.subr.bf16.mxu1 %v3456_v45  ;;  %v3520_v43 = vld [vmem:[#allocation2 + $0x420] ss:$16 sps:$4 sm:$0xff]   ;;  %v4055_v44 = vpack.c.bf16 %v67_v42, %v60_v41  ;;  %v3525_v45 = vld [vmem:[#allocation2 + $0x4c] ss:$16 sps:$4 sm:$0xff]   ;;  %v3528_v46 = vld [vmem:[#allocation2 + $0x404] ss:$16 sps:$4 sm:$0xff]  }
  0x48   :  { %v3564_v7 = vld [vmem:[#allocation2 + $0x544] ss:$16 sps:$4 sm:$0xff]   ;;  %v3562_v9 = vld [vmem:[#allocation2 + $0x540] ss:$16 sps:$4 sm:$0xff]   ;;  %v3603_v41 = vld [vmem:[#allocation2 + $0x4ac] ss:$16 sps:$4 sm:$0xff]  }
  0x49   :  { %1301 = vmatpush2.bf16.msra.mxu0 %v3458_v50  ;;  %v3534_v50 = vld [vmem:[#allocation2 + $0x5e4] ss:$16 sps:$4 sm:$0xff]   ;;  %v3574_v19 = vld [vmem:[#allocation2 + $0x500] ss:$16 sps:$4 sm:$0xff]   ;;  %v3606_v42 = vld [vmem:[#allocation2 + $0x26c] ss:$16 sps:$4 sm:$0xff]  }
  0x4a   :  { %1344 = vmatpush2.bf16.msra.mxu1 %v3459_v51  ;;  %1302 = vmatprep.subr.bf16.mxu0 %v3460_v52  ;;  %v3529_v51 = vld [vmem:[#allocation2 + $0x28] ss:$16 sps:$4 sm:$0xff]   ;;  %v3532_v52 = vld [vmem:[#allocation2 + $0x5e0] ss:$16 sps:$4 sm:$0xff]  }
  0x4b   :  { %1345 = vmatprep.subr.bf16.mxu1 %v3462_v55  ;;  %v3540_v55 = vld [vmem:[#allocation2 + $0x5c4] ss:$16 sps:$4 sm:$0xff]  }
  0x4c   :  { %v59_v20 = vld [vmem:[%s4219_s0 + $0x20] sm:$0xff] }
  0x4d   :  { %1303 = vmatpush2.bf16.msra.mxu0 %v3464_v56  ;;  %v3535_v56 = vld [vmem:[#allocation2 + $0x8] ss:$16 sps:$4 sm:$0xff]  }
  0x4e   :  { %1346 = vmatpush2.bf16.msra.mxu1 %v3465_v57  ;;  %1304 = vmatprep.subr.bf16.mxu0 %v3466_v58  ;;  %v3538_v57 = vld [vmem:[#allocation2 + $0x5c0] ss:$16 sps:$4 sm:$0xff]   ;;  %v3543_v58 = vld [vmem:[#allocation2 + $0x1ec] ss:$16 sps:$4 sm:$0xff]  }
  0x4f   :  { %1347 = vmatprep.subr.bf16.mxu1 %v3468_v59  ;;  %v3546_v59 = vld [vmem:[#allocation2 + $0x5a4] ss:$16 sps:$4 sm:$0xff]  }
  0x51   :  { %1305 = vmatpush2.bf16.msra.mxu0 %v3470_v60  ;;  %v3541_v60 = vld [vmem:[#allocation2 + $0x1e8] ss:$16 sps:$4 sm:$0xff]  }
  0x52   :  { %1348 = vmatpush2.bf16.msra.mxu1 %v3471_v61  ;;  %1306 = vmatprep.subr.bf16.mxu0 %v3472_v62  ;;  %v3544_v61 = vld [vmem:[#allocation2 + $0x5a0] ss:$16 sps:$4 sm:$0xff]   ;;  %v3549_v62 = vld [vmem:[#allocation2 + $0x1cc] ss:$16 sps:$4 sm:$0xff]  }
  0x53   :  { %1349 = vmatprep.subr.bf16.mxu1 %v3474_v63  ;;  %v3552_v63 = vld [vmem:[#allocation2 + $0x584] ss:$16 sps:$4 sm:$0xff]  }
  0x55   :  { %1307 = vmatpush2.bf16.msra.mxu0 %v3476_v0  ;;  %v3547_v0 = vld [vmem:[#allocation2 + $0x1c8] ss:$16 sps:$4 sm:$0xff]  }
  0x56   :  { %1350 = vmatpush2.bf16.msra.mxu1 %v3477_v1  ;;  %1308 = vmatprep.subr.bf16.mxu0 %v3478_v2  ;;  %v3550_v1 = vld [vmem:[#allocation2 + $0x580] ss:$16 sps:$4 sm:$0xff]   ;;  %v3555_v2 = vld [vmem:[#allocation2 + $0x1ac] ss:$16 sps:$4 sm:$0xff]  }
  0x57   :  { %1351 = vmatprep.subr.bf16.mxu1 %v3480_v3  ;;  %v3558_v3 = vld [vmem:[#allocation2 + $0x564] ss:$16 sps:$4 sm:$0xff]  }
  0x59   :  { %1309 = vmatpush2.bf16.msra.mxu0 %v3482_v4  ;;  %v3553_v4 = vld [vmem:[#allocation2 + $0x1a8] ss:$16 sps:$4 sm:$0xff]  }
  0x5a   :  { %1352 = vmatpush2.bf16.msra.mxu1 %v3483_v5  ;;  %1364 = vmatprep.subr.bf16.mxu0 %v3486_v10  ;;  %v3556_v5 = vld [vmem:[#allocation2 + $0x560] ss:$16 sps:$4 sm:$0xff]   ;;  %v3567_v10 = vld [vmem:[#allocation2 + $0x16c] ss:$16 sps:$4 sm:$0xff]  }
  0x5b   :  { %1421 = vmatprep.subr.bf16.mxu1 %v3489_v11  ;;  %v3570_v11 = vld [vmem:[#allocation2 + $0x524] ss:$16 sps:$4 sm:$0xff]  }
  0x5c   :  { %1311 = vmatmul.mubr.bf16.vlgmr.msra.gmra.mxu0 %v4031_v12 }
  0x5d   :  { %1354 = vmatmul.mubr.bf16.vlgmr.msra.gmra.mxu1 %v4033_v13  ;;  %1365 = vmatpush1.bf16.msra.mxu0 %v3484_v14  ;;  %v3565_v14 = vld [vmem:[#allocation2 + $0x168] ss:$16 sps:$4 sm:$0xff]  }
  0x5e   :  { %1422 = vmatpush1.bf16.msra.mxu1 %v3487_v15  ;;  %1366 = vmatprep.subr.bf16.mxu0 %v3492_v16  ;;  %v3568_v15 = vld [vmem:[#allocation2 + $0x520] ss:$16 sps:$4 sm:$0xff]   ;;  %v3573_v16 = vld [vmem:[#allocation2 + $0x14c] ss:$16 sps:$4 sm:$0xff]  }
  0x5f   :  { %1439 = vmatprep.mubr.bf16.mxu1 %v3954_v21  ;;  %1450 = vmatprep.subr.bf16.mxu1 %v3495_v17  ;;  %v3576_v17 = vld [vmem:[#allocation2 + $0x504] ss:$16 sps:$4 sm:$0xff]  }
  0x60   :  { %1396 = vmatprep.mubr.bf16.mxu0 %v4055_v44 }
  0x61   :  { %1367 = vmatpush1.bf16.msra.mxu0 %v3490_v18  ;;  %v3571_v18 = vld [vmem:[#allocation2 + $0x148] ss:$16 sps:$4 sm:$0xff]  }
  0x62   :  { %1368 = vmatprep.subr.bf16.mxu0 %v3498_v22  ;;  %v66_v22 = vld [vmem:[%s4219_s0 + $0x58] sm:$0xff] }
  0x65   :  { %3167 = vmatmul.mubr.msk.bf16.vlgmr.msra.gmra.mxu1 %vm1274_vm0, %v4044_v23  ;;  %1369 = vmatpush1.bf16.msra.mxu0 %v3496_v25  ;;  %v3582_v25 = vld [vmem:[#allocation2 + $0x2ec] ss:$16 sps:$4 sm:$0xff]  }
  0x66   :  { %1451 = vmatpush1.bf16.msra.mxu1 %v3493_v24  ;;  %1370 = vmatprep.subr.bf16.mxu0 %v3504_v27  ;;  %v3579_v24 = vld [vmem:[#allocation2 + $0x12c] ss:$16 sps:$4 sm:$0xff]   ;;  %v3577_v27 = vld [vmem:[#allocation2 + $0x128] ss:$16 sps:$4 sm:$0xff]  }
  0x67   :  { %1452 = vmatprep.subr.bf16.mxu1 %v3501_v26  ;;  %1482 = vmatprep.mubr.bf16.mxu1 %v4013_v53  ;;  %v3537_v53 = vld [vmem:[#allocation2 + $0xc] ss:$16 sps:$4 sm:$0xff]   ;;  %v4064_v26 = vpack.c.bf16 %v66_v22, %v59_v20  ;;  %v3661_v20 = vld [vmem:[#allocation2 + $0x568] ss:$16 sps:$4 sm:$0xff]  }
  0x68   :  { %v3664_v22 = vld [vmem:[#allocation2 + $0x328] ss:$16 sps:$4 sm:$0xff]  }
  0x69   :  { %1371 = vmatpush1.bf16.msra.mxu0 %v3502_v29  ;;  %v3585_v29 = vld [vmem:[#allocation2 + $0x10c] ss:$16 sps:$4 sm:$0xff]  }
  0x6a   :  { %1453 = vmatpush1.bf16.msra.mxu1 %v3499_v28  ;;  %1372 = vmatprep.subr.bf16.mxu0 %v3510_v31  ;;  %v3580_v28 = vld [vmem:[#allocation2 + $0x2e8] ss:$16 sps:$4 sm:$0xff]  }
  0x6b   :  { %1454 = vmatprep.subr.bf16.mxu1 %v3507_v30  ;;  %v3588_v30 = vld [vmem:[#allocation2 + $0x2cc] ss:$16 sps:$4 sm:$0xff]   ;;  %v3583_v31 = vld [vmem:[#allocation2 + $0x108] ss:$16 sps:$4 sm:$0xff]  }
  0x6d   :  { %1373 = vmatpush1.bf16.msra.mxu0 %v3508_v33  ;;  %v3591_v33 = vld [vmem:[#allocation2 + $0x4ec] ss:$16 sps:$4 sm:$0xff]  }
  0x6e   :  { %1455 = vmatpush1.bf16.msra.mxu1 %v3505_v32  ;;  %1374 = vmatprep.subr.bf16.mxu0 %v3516_v35  ;;  %v3586_v32 = vld [vmem:[#allocation2 + $0x2c8] ss:$16 sps:$4 sm:$0xff]  }
  0x6f   :  { %1456 = vmatprep.subr.bf16.mxu1 %v3513_v34  ;;  %v3594_v34 = vld [vmem:[#allocation2 + $0x2ac] ss:$16 sps:$4 sm:$0xff]   ;;  %v3589_v35 = vld [vmem:[#allocation2 + $0x4e8] ss:$16 sps:$4 sm:$0xff]  }
  0x71   :  { %1375 = vmatpush1.bf16.msra.mxu0 %v3514_v37  ;;  %v3597_v37 = vld [vmem:[#allocation2 + $0x4cc] ss:$16 sps:$4 sm:$0xff]  }
  0x72   :  { %1457 = vmatpush1.bf16.msra.mxu1 %v3511_v36  ;;  %1376 = vmatprep.subr.bf16.mxu0 %v3522_v39  ;;  %v3592_v36 = vld [vmem:[#allocation2 + $0x2a8] ss:$16 sps:$4 sm:$0xff]  }
  0x73   :  { %1458 = vmatprep.subr.bf16.mxu1 %v3519_v38  ;;  %v3600_v38 = vld [vmem:[#allocation2 + $0x28c] ss:$16 sps:$4 sm:$0xff]   ;;  %v3595_v39 = vld [vmem:[#allocation2 + $0x4c8] ss:$16 sps:$4 sm:$0xff]  }
  0x75   :  { %1377 = vmatpush1.bf16.msra.mxu0 %v3520_v43  ;;  %v3601_v43 = vld [vmem:[#allocation2 + $0x4a8] ss:$16 sps:$4 sm:$0xff]  }
  0x76   :  { %1459 = vmatpush1.bf16.msra.mxu1 %v3517_v40  ;;  %1378 = vmatprep.subr.bf16.mxu0 %v3528_v46  ;;  %v3598_v40 = vld [vmem:[#allocation2 + $0x288] ss:$16 sps:$4 sm:$0xff]   ;;  %v3612_v46 = vld [vmem:[#allocation2 + $0x24c] ss:$16 sps:$4 sm:$0xff]  }
  0x77   :  { %1460 = vmatprep.subr.bf16.mxu1 %v3525_v45  ;;  %v3604_v45 = vld [vmem:[#allocation2 + $0x268] ss:$16 sps:$4 sm:$0xff]  }
  0x79   :  { %1379 = vmatpush1.bf16.msra.mxu0 %v3526_v48  ;;  %v3615_v48 = vld [vmem:[#allocation2 + $0x46c] ss:$16 sps:$4 sm:$0xff]  }
  0x7a   :  { %1461 = vmatpush1.bf16.msra.mxu1 %v3523_v47  ;;  %1380 = vmatprep.subr.bf16.mxu0 %v3534_v50  ;;  %v3607_v47 = vld [vmem:[#allocation2 + $0x488] ss:$16 sps:$4 sm:$0xff]  }
  0x7b   :  { %1462 = vmatprep.subr.bf16.mxu1 %v3531_v49  ;;  %v3618_v49 = vld [vmem:[#allocation2 + $0x22c] ss:$16 sps:$4 sm:$0xff]   ;;  %v3613_v50 = vld [vmem:[#allocation2 + $0x468] ss:$16 sps:$4 sm:$0xff]  }
  0x7d   :  { %1381 = vmatpush2.bf16.msra.mxu0 %v3532_v52  ;;  %v3624_v52 = vld [vmem:[#allocation2 + $0x20c] ss:$16 sps:$4 sm:$0xff]  }
  0x7e   :  { %1463 = vmatpush1.bf16.msra.mxu1 %v3529_v51  ;;  %1382 = vmatprep.subr.bf16.mxu0 %v3540_v55  ;;  %v3616_v51 = vld [vmem:[#allocation2 + $0x228] ss:$16 sps:$4 sm:$0xff]  }
  0x7f   :  { %1464 = vmatprep.subr.bf16.mxu1 %v3537_v53  ;;  %v3619_v53 = vld [vmem:[#allocation2 + $0x448] ss:$16 sps:$4 sm:$0xff]  }
  0x80   :  { %v3622_v55 = vld [vmem:[#allocation2 + $0x208] ss:$16 sps:$4 sm:$0xff]  }
  0x81   :  { %1383 = vmatpush2.bf16.msra.mxu0 %v3538_v57  ;;  %v3630_v57 = vld [vmem:[#allocation2 + $0x3ec] ss:$16 sps:$4 sm:$0xff]  }
  0x82   :  { %1465 = vmatpush1.bf16.msra.mxu1 %v3535_v56  ;;  %1384 = vmatprep.subr.bf16.mxu0 %v3546_v59  ;;  %v3627_v56 = vld [vmem:[#allocation2 + $0x42c] ss:$16 sps:$4 sm:$0xff]   ;;  %v3628_v59 = vld [vmem:[#allocation2 + $0x3e8] ss:$16 sps:$4 sm:$0xff]  }
  0x83   :  { %1466 = vmatprep.subr.bf16.mxu1 %v3543_v58  ;;  %v3625_v58 = vld [vmem:[#allocation2 + $0x428] ss:$16 sps:$4 sm:$0xff]  }
  0x85   :  { %1385 = vmatpush2.bf16.msra.mxu0 %v3544_v61  ;;  %v3636_v61 = vld [vmem:[#allocation2 + $0x3cc] ss:$16 sps:$4 sm:$0xff]  }
  0x86   :  { %1467 = vmatpush2.bf16.msra.mxu1 %v3541_v60  ;;  %1386 = vmatprep.subr.bf16.mxu0 %v3552_v63  ;;  %v3633_v60 = vld [vmem:[#allocation2 + $0x40c] ss:$16 sps:$4 sm:$0xff]   ;;  %v3634_v63 = vld [vmem:[#allocation2 + $0x3c8] ss:$16 sps:$4 sm:$0xff]  }
  0x87   :  { %1468 = vmatprep.subr.bf16.mxu1 %v3549_v62  ;;  %v3631_v62 = vld [vmem:[#allocation2 + $0x408] ss:$16 sps:$4 sm:$0xff]  }
  0x89   :  { %1387 = vmatpush2.bf16.msra.mxu0 %v3550_v1  ;;  %v3642_v1 = vld [vmem:[#allocation2 + $0x3ac] ss:$16 sps:$4 sm:$0xff]  }
  0x8a   :  { %1469 = vmatpush2.bf16.msra.mxu1 %v3547_v0  ;;  %1388 = vmatprep.subr.bf16.mxu0 %v3558_v3  ;;  %v3639_v0 = vld [vmem:[#allocation2 + $0x5ec] ss:$16 sps:$4 sm:$0xff]   ;;  %v3640_v3 = vld [vmem:[#allocation2 + $0x3a8] ss:$16 sps:$4 sm:$0xff]  }
  0x8b   :  { %1470 = vmatprep.subr.bf16.mxu1 %v3555_v2  ;;  %v3637_v2 = vld [vmem:[#allocation2 + $0x5e8] ss:$16 sps:$4 sm:$0xff]  }
  0x8d   :  { %1389 = vmatpush2.bf16.msra.mxu0 %v3556_v5  ;;  %v3648_v5 = vld [vmem:[#allocation2 + $0x38c] ss:$16 sps:$4 sm:$0xff]  }
  0x8e   :  { %1471 = vmatpush2.bf16.msra.mxu1 %v3553_v4  ;;  %1390 = vmatprep.subr.bf16.mxu0 %v3564_v7  ;;  %v3645_v4 = vld [vmem:[#allocation2 + $0x5cc] ss:$16 sps:$4 sm:$0xff]   ;;  %v3646_v7 = vld [vmem:[#allocation2 + $0x388] ss:$16 sps:$4 sm:$0xff]  }
  0x8f   :  { %1472 = vmatprep.subr.bf16.mxu1 %v3561_v6  ;;  %v3643_v6 = vld [vmem:[#allocation2 + $0x5c8] ss:$16 sps:$4 sm:$0xff]  }
  0x91   :  { %1391 = vmatpush2.bf16.msra.mxu0 %v3562_v9  ;;  %v3654_v9 = vld [vmem:[#allocation2 + $0x36c] ss:$16 sps:$4 sm:$0xff]  }
  0x92   :  { %1473 = vmatpush2.bf16.msra.mxu1 %v3559_v8  ;;  %1392 = vmatprep.subr.bf16.mxu0 %v3570_v11  ;;  %v3651_v8 = vld [vmem:[#allocation2 + $0x5ac] ss:$16 sps:$4 sm:$0xff]   ;;  %v3652_v11 = vld [vmem:[#allocation2 + $0x368] ss:$16 sps:$4 sm:$0xff]  }
  0x93   :  { %1474 = vmatprep.subr.bf16.mxu1 %v3567_v10  ;;  %v3649_v10 = vld [vmem:[#allocation2 + $0x5a8] ss:$16 sps:$4 sm:$0xff]  }
  0x95   :  { %1393 = vmatpush2.bf16.msra.mxu0 %v3568_v15  ;;  %v3660_v15 = vld [vmem:[#allocation2 + $0x34c] ss:$16 sps:$4 sm:$0xff]  }
  0x96   :  { %1475 = vmatpush2.bf16.msra.mxu1 %v3565_v14  ;;  %1394 = vmatprep.subr.bf16.mxu0 %v3576_v17  ;;  %v3657_v14 = vld [vmem:[#allocation2 + $0x58c] ss:$16 sps:$4 sm:$0xff]   ;;  %v3658_v17 = vld [vmem:[#allocation2 + $0x348] ss:$16 sps:$4 sm:$0xff]  }
  0x97   :  { %1476 = vmatprep.subr.bf16.mxu1 %v3573_v16  ;;  %v3655_v16 = vld [vmem:[#allocation2 + $0x588] ss:$16 sps:$4 sm:$0xff]  }
  0x99   :  { %1395 = vmatpush2.bf16.msra.mxu0 %v3574_v19  ;;  %v3666_v19 = vld [vmem:[#allocation2 + $0x32c] ss:$16 sps:$4 sm:$0xff]  }
  0x9a   :  { %1477 = vmatpush2.bf16.msra.mxu1 %v3571_v18  ;;  %1493 = vmatprep.subr.bf16.mxu0 %v3582_v25  ;;  %v3663_v18 = vld [vmem:[#allocation2 + $0x56c] ss:$16 sps:$4 sm:$0xff]  }
  0x9b   :  { %1478 = vmatprep.subr.bf16.mxu1 %v3579_v24  ;;  %v3669_v24 = vld [vmem:[#allocation2 + $0x54c] ss:$16 sps:$4 sm:$0xff]  }
  0x9c   :  { %1397 = vmatmul.mubr.bf16.vlgmr.msra.gmra.mxu0 %v4064_v26  ;;  %v3672_v25 = vld [vmem:[#allocation2 + $0x30c] ss:$16 sps:$4 sm:$0xff]  }
  0x9d   :  { %1494 = vmatpush1.bf16.msra.mxu0 %v3580_v28  ;;  %1525 = vmatprep.mubr.bf16.mxu0 %v4015_v54  ;;  %v3609_v54 = vld [vmem:[#allocation2 + $0x48c] ss:$16 sps:$4 sm:$0xff]   ;;  %v3670_v28 = vld [vmem:[#allocation2 + $0x308] ss:$16 sps:$4 sm:$0xff]  }
  0x9e   :  { %1479 = vmatpush2.bf16.msra.mxu1 %v3577_v27  ;;  %1495 = vmatprep.subr.bf16.mxu0 %v3588_v30  ;;  %v3667_v27 = vld [vmem:[#allocation2 + $0x548] ss:$16 sps:$4 sm:$0xff]   ;;  %v3678_v30 = vld [vmem:[#allocation2 + $0x60c] ss:$16 sps:$4 sm:$0xff]  }
  0x9f   :  { %1480 = vmatprep.subr.bf16.mxu1 %v3585_v29  ;;  %v3675_v29 = vld [vmem:[#allocation2 + $0x52c] ss:$16 sps:$4 sm:$0xff]  }
  0xa1   :  { %1496 = vmatpush1.bf16.msra.mxu0 %v3586_v32  ;;  %v3676_v32 = vld [vmem:[#allocation2 + $0x608] ss:$16 sps:$4 sm:$0xff]  }
  0xa2   :  { %1481 = vmatpush2.bf16.msra.mxu1 %v3583_v31  ;;  %1497 = vmatprep.subr.bf16.mxu0 %v3594_v34  ;;  %v3673_v31 = vld [vmem:[#allocation2 + $0x528] ss:$16 sps:$4 sm:$0xff]   ;;  %v3684_v34 = vld [vmem:[#allocation4 + $0xe4] ss:$16 sps:$4 sm:$0xff]  }
  0xa3   :  { %1536 = vmatprep.subr.bf16.mxu1 %v3591_v33  ;;  %v3681_v33 = vld [vmem:[#allocation2 + $0x50c] ss:$16 sps:$4 sm:$0xff]  }
  0xa5   :  { %1483 = vmatmul.mubr.bf16.vlgmr.msra.gmra.mxu1 %v4031_v12  ;;  %1498 = vmatpush1.bf16.msra.mxu0 %v3592_v36  ;;  %v3610_v12 = vld [vmem:[#allocation2 + $0x248] ss:$16 sps:$4 sm:$0xff]   ;;  %v3682_v36 = vld [vmem:[#allocation4 + $0xe0] ss:$16 sps:$4 sm:$0xff]  }
  0xa6   :  { %1537 = vmatpush1.bf16.msra.mxu1 %v3589_v35  ;;  %1499 = vmatprep.subr.bf16.mxu0 %v3600_v38  ;;  %v3679_v35 = vld [vmem:[#allocation2 + $0x508] ss:$16 sps:$4 sm:$0xff]   ;;  %v3685_v38 = vld [vmem:[#allocation4 + $0xc0] ss:$16 sps:$4 sm:$0xff]  }
  0xa7   :  { %1538 = vmatprep.subr.bf16.mxu1 %v3597_v37  ;;  %1568 = vmatprep.mubr.bf16.mxu1 %v4055_v44  ;;  %v3621_v44 = vld [vmem:[#allocation2 + $0x44c] ss:$16 sps:$4 sm:$0xff]   ;;  %v3687_v37 = vld [vmem:[#allocation4 + $0xc4] ss:$16 sps:$4 sm:$0xff]  }
  0xa9   :  { %1500 = vmatpush1.bf16.msra.mxu0 %v3598_v40  ;;  %v3688_v40 = vld [vmem:[#allocation4 + $0xa0] ss:$16 sps:$4 sm:$0xff]  }
  0xaa   :  { %1539 = vmatpush1.bf16.msra.mxu1 %v3595_v39  ;;  %1501 = vmatprep.subr.bf16.mxu0 %v3606_v42  ;;  %v3690_v39 = vld [vmem:[#allocation4 + $0xa4] ss:$16 sps:$4 sm:$0xff]   ;;  %v3694_v42 = vld [vmem:[#allocation4 + $0x60] ss:$16 sps:$4 sm:$0xff]  }
  0xab   :  { %1540 = vmatprep.subr.bf16.mxu1 %v3603_v41  ;;  %v3691_v41 = vld [vmem:[#allocation4 + $0x80] ss:$16 sps:$4 sm:$0xff]  }
  0xad   :  { %1502 = vmatpush1.bf16.msra.mxu0 %v3604_v45  ;;  %v3738_v45 = vld [vmem:[#allocation4 + $0x2e4] ss:$16 sps:$4 sm:$0xff]  }
  0xae   :  { %1541 = vmatpush1.bf16.msra.mxu1 %v3601_v43  ;;  %1503 = vmatprep.subr.bf16.mxu0 %v3612_v46  ;;  %v3736_v43 = vld [vmem:[#allocation4 + $0x2e0] ss:$16 sps:$4 sm:$0xff]   ;;  %v3744_v46 = vld [vmem:[#allocation4 + $0x2c4] ss:$16 sps:$4 sm:$0xff]  }
  0xaf   :  { %1542 = vmatprep.subr.bf16.mxu1 %v3609_v54  ;;  %v3742_v54 = vld [vmem:[#allocation4 + $0x2c0] ss:$16 sps:$4 sm:$0xff]  }
  0xb1   :  { %1504 = vmatpush1.bf16.msra.mxu0 %v3610_v12  ;;  %v3700_v12 = vld [vmem:[#allocation4 + $0x20] ss:$16 sps:$4 sm:$0xff]  }
  0xb2   :  { %1543 = vmatpush1.bf16.msra.mxu1 %v3607_v47  ;;  %1505 = vmatprep.subr.bf16.mxu0 %v3618_v49  ;;  %v3702_v47 = vld [vmem:[#allocation4 + $0x24] ss:$16 sps:$4 sm:$0xff]  }
  0xb3   :  { %1544 = vmatprep.subr.bf16.mxu1 %v3615_v48  ;;  %v3748_v48 = vld [vmem:[#allocation4 + $0x2a0] ss:$16 sps:$4 sm:$0xff]   ;;  %v3750_v49 = vld [vmem:[#allocation4 + $0x2a4] ss:$16 sps:$4 sm:$0xff]  }
  0xb5   :  { %1506 = vmatpush1.bf16.msra.mxu0 %v3616_v51  ;;  %v3703_v51 = vld [vmem:[#allocation4] ss:$16 sps:$4 sm:$0xff]  }
  0xb6   :  { %1545 = vmatpush1.bf16.msra.mxu1 %v3613_v50  ;;  %1507 = vmatprep.subr.bf16.mxu0 %v3624_v52  ;;  %v3705_v50 = vld [vmem:[#allocation4 + $0x4] ss:$16 sps:$4 sm:$0xff]  }
  0xb7   :  { %1546 = vmatprep.subr.bf16.mxu1 %v3621_v44  ;;  %v3754_v44 = vld [vmem:[#allocation4 + $0x280] ss:$16 sps:$4 sm:$0xff]   ;;  %v3756_v52 = vld [vmem:[#allocation4 + $0x284] ss:$16 sps:$4 sm:$0xff]  }
  0xb9   :  { %1508 = vmatpush1.bf16.msra.mxu0 %v3622_v55  ;;  %v3706_v55 = vld [vmem:[#allocation4 + $0x1e0] ss:$16 sps:$4 sm:$0xff]  }
  0xba   :  { %1547 = vmatpush1.bf16.msra.mxu1 %v3619_v53  ;;  %1509 = vmatprep.subr.bf16.mxu0 %v3630_v57  ;;  %v3708_v53 = vld [vmem:[#allocation4 + $0x1e4] ss:$16 sps:$4 sm:$0xff]  }
  0xbb   :  { %1548 = vmatprep.subr.bf16.mxu1 %v3627_v56  ;;  %v3760_v56 = vld [vmem:[#allocation4 + $0x260] ss:$16 sps:$4 sm:$0xff]   ;;  %v3762_v57 = vld [vmem:[#allocation4 + $0x264] ss:$16 sps:$4 sm:$0xff]  }
  0xbd   :  { %1510 = vmatpush2.bf16.msra.mxu0 %v3628_v59  ;;  %v3709_v59 = vld [vmem:[#allocation4 + $0x1c0] ss:$16 sps:$4 sm:$0xff]  }
  0xbe   :  { %1549 = vmatpush1.bf16.msra.mxu1 %v3625_v58  ;;  %1511 = vmatprep.subr.bf16.mxu0 %v3636_v61  ;;  %v3711_v58 = vld [vmem:[#allocation4 + $0x1c4] ss:$16 sps:$4 sm:$0xff]  }
  0xbf   :  { %1550 = vmatprep.subr.bf16.mxu1 %v3633_v60  ;;  %v3766_v60 = vld [vmem:[#allocation4 + $0x240] ss:$16 sps:$4 sm:$0xff]   ;;  %v3768_v61 = vld [vmem:[#allocation4 + $0x244] ss:$16 sps:$4 sm:$0xff]  }
  0xc1   :  { %1512 = vmatpush2.bf16.msra.mxu0 %v3634_v63  ;;  %v3712_v63 = vld [vmem:[#allocation4 + $0x1a0] ss:$16 sps:$4 sm:$0xff]  }
  0xc2   :  { %1551 = vmatpush1.bf16.msra.mxu1 %v3631_v62  ;;  %1513 = vmatprep.subr.bf16.mxu0 %v3642_v1  ;;  %v3714_v62 = vld [vmem:[#allocation4 + $0x1a4] ss:$16 sps:$4 sm:$0xff]  }
  0xc3   :  { %1552 = vmatprep.subr.bf16.mxu1 %v3639_v0  ;;  %v3772_v0 = vld [vmem:[#allocation4 + $0x220] ss:$16 sps:$4 sm:$0xff]   ;;  %v3774_v1 = vld [vmem:[#allocation4 + $0x224] ss:$16 sps:$4 sm:$0xff]  }
  0xc5   :  { %1514 = vmatpush2.bf16.msra.mxu0 %v3640_v3  ;;  %v3715_v3 = vld [vmem:[#allocation4 + $0x180] ss:$16 sps:$4 sm:$0xff]  }
  0xc6   :  { %1553 = vmatpush2.bf16.msra.mxu1 %v3637_v2  ;;  %1515 = vmatprep.subr.bf16.mxu0 %v3648_v5  ;;  %v3717_v2 = vld [vmem:[#allocation4 + $0x184] ss:$16 sps:$4 sm:$0xff]  }
  0xc7   :  { %1554 = vmatprep.subr.bf16.mxu1 %v3645_v4  ;;  %v3778_v4 = vld [vmem:[#allocation4 + $0x200] ss:$16 sps:$4 sm:$0xff]   ;;  %v3780_v5 = vld [vmem:[#allocation4 + $0x204] ss:$16 sps:$4 sm:$0xff]  }
  0xc9   :  { %1516 = vmatpush2.bf16.msra.mxu0 %v3646_v7  ;;  %v3718_v7 = vld [vmem:[#allocation4 + $0x160] ss:$16 sps:$4 sm:$0xff]  }
  0xca   :  { %1555 = vmatpush2.bf16.msra.mxu1 %v3643_v6  ;;  %1517 = vmatprep.subr.bf16.mxu0 %v3654_v9  ;;  %v3720_v6 = vld [vmem:[#allocation4 + $0x164] ss:$16 sps:$4 sm:$0xff]  }
  0xcb   :  { %1556 = vmatprep.subr.bf16.mxu1 %v3651_v8  ;;  %v3784_v8 = vld [vmem:[#allocation4 + $0x3e0] ss:$16 sps:$4 sm:$0xff]   ;;  %v3786_v9 = vld [vmem:[#allocation4 + $0x3e4] ss:$16 sps:$4 sm:$0xff]  }
  0xcd   :  { %1518 = vmatpush2.bf16.msra.mxu0 %v3652_v11  ;;  %v3721_v11 = vld [vmem:[#allocation4 + $0x140] ss:$16 sps:$4 sm:$0xff]  }
  0xce   :  { %1557 = vmatpush2.bf16.msra.mxu1 %v3649_v10  ;;  %1519 = vmatprep.subr.bf16.mxu0 %v3660_v15  ;;  %v3723_v10 = vld [vmem:[#allocation4 + $0x144] ss:$16 sps:$4 sm:$0xff]  }
  0xcf   :  { %1558 = vmatprep.subr.bf16.mxu1 %v3657_v14  ;;  %v3790_v14 = vld [vmem:[#allocation4 + $0x3c0] ss:$16 sps:$4 sm:$0xff]   ;;  %v3792_v15 = vld [vmem:[#allocation4 + $0x3c4] ss:$16 sps:$4 sm:$0xff]  }
  0xd1   :  { %1520 = vmatpush2.bf16.msra.mxu0 %v3658_v17  ;;  %v3724_v17 = vld [vmem:[#allocation4 + $0x120] ss:$16 sps:$4 sm:$0xff]  }
  0xd2   :  { %1559 = vmatpush2.bf16.msra.mxu1 %v3655_v16  ;;  %1521 = vmatprep.subr.bf16.mxu0 %v3666_v19  ;;  %v3726_v16 = vld [vmem:[#allocation4 + $0x124] ss:$16 sps:$4 sm:$0xff]  }
  0xd3   :  { %1560 = vmatprep.subr.bf16.mxu1 %v3663_v18  ;;  %v3796_v18 = vld [vmem:[#allocation4 + $0x3a0] ss:$16 sps:$4 sm:$0xff]   ;;  %v3798_v19 = vld [vmem:[#allocation4 + $0x3a4] ss:$16 sps:$4 sm:$0xff]  }
  0xd5   :  { %1522 = vmatpush2.bf16.msra.mxu0 %v3664_v22  ;;  %v3727_v22 = vld [vmem:[#allocation4 + $0x100] ss:$16 sps:$4 sm:$0xff]  }
  0xd6   :  { %1561 = vmatpush2.bf16.msra.mxu1 %v3661_v20  ;;  %1523 = vmatprep.subr.bf16.mxu0 %v3672_v25  ;;  %v3729_v20 = vld [vmem:[#allocation4 + $0x104] ss:$16 sps:$4 sm:$0xff]   ;;  %v3732_v25 = vld [vmem:[#allocation4 + $0xec] ss:$16 sps:$4 sm:$0xff]  }
  0xd7   :  { %1562 = vmatprep.subr.bf16.mxu1 %v3669_v24  ;;  %v3804_v24 = vld [vmem:[#allocation4 + $0x384] ss:$16 sps:$4 sm:$0xff]  }
  0xd9   :  { %1524 = vmatpush2.bf16.msra.mxu0 %v3670_v28  ;;  %v3810_v28 = vld [vmem:[#allocation4 + $0x364] ss:$16 sps:$4 sm:$0xff]  }
  0xda   :  { %1563 = vmatpush2.bf16.msra.mxu1 %v3667_v27  ;;  %1593 = vmatprep.subr.bf16.mxu0 %v3678_v30  ;;  %v3802_v27 = vld [vmem:[#allocation4 + $0x380] ss:$16 sps:$4 sm:$0xff]   ;;  %v3816_v30 = vld [vmem:[#allocation4 + $0x344] ss:$16 sps:$4 sm:$0xff]  }
  0xdb   :  { %1564 = vmatprep.subr.bf16.mxu1 %v3675_v29  ;;  %v3808_v29 = vld [vmem:[#allocation4 + $0x360] ss:$16 sps:$4 sm:$0xff]  }
  0xdc   :  { %1526 = vmatmul.mubr.bf16.vlgmr.msra.gmra.mxu0 %v4033_v13  ;;  %v3693_v13 = vld [vmem:[#allocation4 + $0x84] ss:$16 sps:$4 sm:$0xff]  }
  0xdd   :  { %1594 = vmatpush1.bf16.msra.mxu0 %v3676_v32  ;;  %1611 = vmatprep.mubr.bf16.mxu0 %v3954_v21  ;;  %v3696_v21 = vld [vmem:[#allocation4 + $0x64] ss:$16 sps:$4 sm:$0xff]  }
  0xde   :  { %1565 = vmatpush2.bf16.msra.mxu1 %v3673_v31  ;;  %2424 = vmatprep.subr.bf16.mxu0 %v3684_v34  ;;  %v3814_v31 = vld [vmem:[#allocation4 + $0x340] ss:$16 sps:$4 sm:$0xff]   ;;  %v3822_v32 = vld [vmem:[#allocation4 + $0x324] ss:$16 sps:$4 sm:$0xff]  }
  0xdf   :  { %1566 = vmatprep.subr.bf16.mxu1 %v3681_v33  ;;  %v3820_v33 = vld [vmem:[#allocation4 + $0x320] ss:$16 sps:$4 sm:$0xff]   ;;  %v3825_v34 = vld [vmem:[#allocation4 + $0x304] ss:$16 sps:$4 sm:$0xff]  }
  0xe2   :  { %1567 = vmatpush2.bf16.msra.mxu1 %v3679_v35  ;;  %v3823_v35 = vld [vmem:[#allocation4 + $0x300] ss:$16 sps:$4 sm:$0xff]  }
  0xe3   :  { %2467 = vmatprep.subr.bf16.mxu1 %v3738_v45  ;;  %v4082_v45 = vld [vmem:[%s4221_s2] sm:$0xf] }
  0xe4   :  { %3168 = vmatmul.mubr.msk.bf16.vlgmr.msra.gmra.mxu0 %vm1274_vm0, %v4044_v23  ;;  %v3697_v23 = vld [vmem:[#allocation4 + $0x40] ss:$16 sps:$4 sm:$0xff]  }
  0xe5   :  { %1569 = vmatmul.mubr.bf16.vlgmr.msra.gmra.mxu1 %v4064_v26  ;;  %2425 = vmatpush1.bf16.msra.mxu0 %v3682_v36  ;;  %v3699_v26 = vld [vmem:[#allocation4 + $0x44] ss:$16 sps:$4 sm:$0xff]   ;;  %v3828_v36 = vld [vmem:[#allocation4 + $0x2ec] ss:$16 sps:$4 sm:$0xff]  }
  0xe6   :  { %2426 = vmatprep.subr.bf16.mxu0 %v3687_v37  ;;  %2468 = vmatpush1.bf16.msra.mxu1 %v3736_v43 }
  0xe7   :  { %2469 = vmatprep.subr.bf16.mxu1 %v3744_v46 }
  0xe9   :  { %2427 = vmatpush1.bf16.msra.mxu0 %v3685_v38  ;;  %v274_v38 = vlaneseq }
  0xea   :  { %2428 = vmatprep.subr.bf16.mxu0 %v3690_v39  ;;  %2470 = vmatpush1.bf16.msra.mxu1 %v3742_v54 }
  0xeb   :  { %2471 = vmatprep.subr.bf16.mxu1 %v3750_v49 }
  0xed   :  { %2429 = vmatpush1.bf16.msra.mxu0 %v3688_v40  ;;  %v4075_v40 = vshrl.u32 %v274_v38, 7  ;;  %v3787_v38 = vld [vmem:[#allocation4 + $0x1a8] ss:$16 sps:$4 sm:$0xff]  }
  0xee   :  { %2430 = vmatprep.subr.bf16.mxu0 %v3693_v13  ;;  %2472 = vmatpush1.bf16.msra.mxu1 %v3748_v48 }
  0xef   :  { %2473 = vmatprep.subr.bf16.mxu1 %v3756_v52 }
  0xf1   :  { %2431 = vmatpush1.bf16.msra.mxu0 %v3691_v41 }
  0xf2   :  { %2432 = vmatprep.subr.bf16.mxu0 %v3696_v21  ;;  %2474 = vmatpush1.bf16.msra.mxu1 %v3754_v44  ;;  %v280_v21 = vsub.s32 1, %v4075_v40 }
  0xf3   :  { %2475 = vmatprep.subr.bf16.mxu1 %v3762_v57 }
  0xf5   :  { %2433 = vmatpush1.bf16.msra.mxu0 %v3694_v42  ;;  %v276_v42 = vsub.s32 0, %v4075_v40 }
  0xf6   :  { %2434 = vmatprep.subr.bf16.mxu0 %v3699_v26  ;;  %2476 = vmatpush1.bf16.msra.mxu1 %v3760_v56 }
  0xf7   :  { %2477 = vmatprep.subr.bf16.mxu1 %v3768_v61  ;;  %v277_v54 = vrot.slane %v4082_v45, %v276_v42 }
  0xf9   :  { %2435 = vmatpush1.bf16.msra.mxu0 %v3697_v23  ;;  %v281_v23 = vrot.slane %v4082_v45, %v280_v21 }
  0xfa   :  { %2436 = vmatprep.subr.bf16.mxu0 %v3702_v47  ;;  %2478 = vmatpush1.bf16.msra.mxu1 %v3766_v60 }
  0xfb   :  { %2479 = vmatprep.subr.bf16.mxu1 %v3774_v1 }
  0xfd   :  { %2437 = vmatpush1.bf16.msra.mxu0 %v3700_v12 }
  0xfe   :  { %2438 = vmatprep.subr.bf16.mxu0 %v3705_v50  ;;  %2480 = vmatpush1.bf16.msra.mxu1 %v3772_v0 }
  0xff   :  { %2481 = vmatprep.subr.bf16.mxu1 %v3780_v5 }
 0x101   :  { %2439 = vmatpush1.bf16.msra.mxu0 %v3703_v51 }
 0x102   :  { %2440 = vmatprep.subr.bf16.mxu0 %v3708_v53  ;;  %2482 = vmatpush1.bf16.msra.mxu1 %v3778_v4 }
 0x103   :  { %2483 = vmatprep.subr.bf16.mxu1 %v3786_v9 }
 0x105   :  { %2441 = vmatpush2.bf16.msra.mxu0 %v3706_v55 }
 0x106   :  { %2442 = vmatprep.subr.bf16.mxu0 %v3711_v58  ;;  %2484 = vmatpush2.bf16.msra.mxu1 %v3784_v8 }
 0x107   :  { %2485 = vmatprep.subr.bf16.mxu1 %v3792_v15 }
 0x109   :  { %2443 = vmatpush2.bf16.msra.mxu0 %v3709_v59 }
 0x10a   :  { %2444 = vmatprep.subr.bf16.mxu0 %v3714_v62  ;;  %2486 = vmatpush2.bf16.msra.mxu1 %v3790_v14  ;;  %v3730_v14 = vld [vmem:[#allocation4 + $0xe8] ss:$16 sps:$4 sm:$0xff]  }
 0x10b   :  { %2487 = vmatprep.subr.bf16.mxu1 %v3798_v19  ;;  %v3739_v19 = vld [vmem:[#allocation4 + $0xa8] ss:$16 sps:$4 sm:$0xff]  }
 0x10d   :  { %2445 = vmatpush2.bf16.msra.mxu0 %v3712_v63 }
 0x10e   :  { %2446 = vmatprep.subr.bf16.mxu0 %v3717_v2  ;;  %2488 = vmatpush2.bf16.msra.mxu1 %v3796_v18  ;;  %v3741_v18 = vld [vmem:[#allocation4 + $0xac] ss:$16 sps:$4 sm:$0xff]  }
 0x10f   :  { %2489 = vmatprep.subr.bf16.mxu1 %v3804_v24  ;;  %v3753_v24 = vld [vmem:[#allocation4 + $0x6c] ss:$16 sps:$4 sm:$0xff]  }
 0x111   :  { %2447 = vmatpush2.bf16.msra.mxu0 %v3715_v3 }
 0x112   :  { %2448 = vmatprep.subr.bf16.mxu0 %v3720_v6  ;;  %2490 = vmatpush2.bf16.msra.mxu1 %v3802_v27  ;;  %v3759_v27 = vld [vmem:[#allocation4 + $0x4c] ss:$16 sps:$4 sm:$0xff]  }
 0x113   :  { %2491 = vmatprep.subr.bf16.mxu1 %v3810_v28  ;;  %v3757_v28 = vld [vmem:[#allocation4 + $0x48] ss:$16 sps:$4 sm:$0xff]  }
 0x115   :  { %2449 = vmatpush2.bf16.msra.mxu0 %v3718_v7 }
 0x116   :  { %2450 = vmatprep.subr.bf16.mxu0 %v3723_v10  ;;  %2492 = vmatpush2.bf16.msra.mxu1 %v3808_v29  ;;  %v3765_v29 = vld [vmem:[#allocation4 + $0x2c] ss:$16 sps:$4 sm:$0xff]  }
 0x117   :  { %2493 = vmatprep.subr.bf16.mxu1 %v3816_v30  ;;  %v3763_v30 = vld [vmem:[#allocation4 + $0x28] ss:$16 sps:$4 sm:$0xff]  }
 0x119   :  { %2451 = vmatpush2.bf16.msra.mxu0 %v3721_v11 }
 0x11a   :  { %2452 = vmatprep.subr.bf16.mxu0 %v3726_v16  ;;  %2494 = vmatpush2.bf16.msra.mxu1 %v3814_v31  ;;  %v3735_v16 = vld [vmem:[#allocation4 + $0xcc] ss:$16 sps:$4 sm:$0xff]  }
 0x11b   :  { %2495 = vmatprep.subr.bf16.mxu1 %v3822_v32  ;;  %v3771_v31 = vld [vmem:[#allocation4 + $0xc] ss:$16 sps:$4 sm:$0xff]   ;;  %v3769_v32 = vld [vmem:[#allocation4 + $0x8] ss:$16 sps:$4 sm:$0xff]  }
 0x11c   :  { %v1312_v13 = vpop.f32.mrf.mxu0 }
 0x11d   :  { %2453 = vmatpush2.bf16.msra.mxu0 %v3724_v17  ;;  %v1355_v37 = vpop.f32.mrf.mxu1  ;;  %v1313_v48 = vadd.f32 %v1312_v13, %v277_v54  ;;  %v3733_v17 = vld [vmem:[#allocation4 + $0xc8] ss:$16 sps:$4 sm:$0xff]  }
 0x11e   :  { %2454 = vmatprep.subr.bf16.mxu0 %v3729_v20  ;;  %2496 = vmatpush2.bf16.msra.mxu1 %v3820_v33  ;;  %v1314_v43 = vpop.f32.mrf.mxu0  ;;  %v3747_v20 = vld [vmem:[#allocation4 + $0x8c] ss:$16 sps:$4 sm:$0xff]   ;;  %v3793_v13 = vld [vmem:[#allocation4 + $0x188] ss:$16 sps:$4 sm:$0xff]  }
 0x11f   :  { %2497 = vmatprep.subr.bf16.mxu1 %v3825_v34  ;;  %v1357_v39 = vpop.f32.mrf.mxu1  ;;  %v1315_v12 = vadd.f32 %v1314_v43, %v281_v23  ;;  %v1356_v55 = vadd.f32 %v1355_v37, %v1313_v48  ;;  %v3777_v33 = vld [vmem:[#allocation4 + $0x1ec] ss:$16 sps:$4 sm:$0xff]   ;;  %v3775_v34 = vld [vmem:[#allocation4 + $0x1e8] ss:$16 sps:$4 sm:$0xff]  }
 0x120   :  { %v1316_v46 = vpop.f32.mrf.mxu0  ;;  %v3789_v37 = vld [vmem:[#allocation4 + $0x1ac] ss:$16 sps:$4 sm:$0xff]   ;;  %v3805_v48 = vld [vmem:[#allocation4 + $0x148] ss:$16 sps:$4 sm:$0xff]  }
 0x121   :  { %2455 = vmatpush2.bf16.msra.mxu0 %v3727_v22  ;;  %v1359_v41 = vpop.f32.mrf.mxu1  ;;  %v1317_v50 = vadd.f32 %v1316_v46, %v277_v54  ;;  %v1358_v52 = vadd.f32 %v1357_v39, %v1315_v12  ;;  %v3745_v22 = vld [vmem:[#allocation4 + $0x88] ss:$16 sps:$4 sm:$0xff]   ;;  %v3795_v39 = vld [vmem:[#allocation4 + $0x18c] ss:$16 sps:$4 sm:$0xff]   ;;  %v288_v46 = vsub.s32 3, %v4075_v40 }
 0x122   :  { %2510 = vmatprep.subr.bf16.mxu0 %v3732_v25  ;;  %2498 = vmatpush2.bf16.msra.mxu1 %v3823_v35  ;;  %v1318_v49 = vpop.f32.mrf.mxu0  ;;  %v3751_v25 = vld [vmem:[#allocation4 + $0x68] ss:$16 sps:$4 sm:$0xff]   ;;  %v3783_v35 = vld [vmem:[#allocation4 + $0x1cc] ss:$16 sps:$4 sm:$0xff]  }
 0x123   :  { %2553 = vmatprep.subr.bf16.mxu1 %v3828_v36  ;;  %v1361_v26 = vpop.f32.mrf.mxu1  ;;  %v1319_v53 = vadd.f32 %v1318_v49, %v281_v23  ;;  %v1360_v57 = vadd.f32 %v1359_v41, %v1317_v50  ;;  %v3781_v36 = vld [vmem:[#allocation4 + $0x1c8] ss:$16 sps:$4 sm:$0xff]   ;;  %v3801_v43 = vld [vmem:[#allocation4 + $0x16c] ss:$16 sps:$4 sm:$0xff]  }
 0x124   :  { %v3807_v54 = vld [vmem:[#allocation4 + $0x14c] ss:$16 sps:$4 sm:$0xff]  }
 0x125   :  { %v1441_v47 = vpop.f32.mrf.mxu1  ;;  %v1362_v62 = vadd.f32 %v1361_v26, %v1319_v53  ;;  %v3799_v26 = vld [vmem:[#allocation4 + $0x168] ss:$16 sps:$4 sm:$0xff]  }
 0x127   :  { %v1443_v51 = vpop.f32.mrf.mxu1 }
 0x129   :  { %v1445_v59 = vpop.f32.mrf.mxu1 }
 0x12b   :  { %v1447_v4 = vpop.f32.mrf.mxu1 }
 0x15c   :  { %v1398_v44 = vpop.f32.mrf.mxu0 }
 0x15d   :  { %v1399_v60 = vadd.f32 %v1398_v44, %v1356_v55  ;;  %v289_v44 = vrot.slane %v4082_v45, %v288_v46  ;;  %v3811_v55 = vld [vmem:[#allocation4 + $0x128] ss:$16 sps:$4 sm:$0xff]  }
 0x15e   :  { %v1400_v56 = vpop.f32.mrf.mxu0 }
 0x15f   :  { %v1401_v58 = vadd.f32 %v1400_v56, %v1358_v52  ;;  %v1442_v5 = vadd.f32 %v1441_v47, %v1399_v60  ;;  %v284_v47 = vsub.s32 2, %v4075_v40 }
 0x160   :  { %v1402_v61 = vpop.f32.mrf.mxu0 }
 0x161   :  { %v1403_v63 = vadd.f32 %v1402_v61, %v1360_v57  ;;  %v1444_v1 = vadd.f32 %v1443_v51, %v1401_v58  ;;  %v1622_v10 = vmax.f32 %v1442_v5, 0.0  ;;  %v3813_v51 = vld [vmem:[#allocation4 + $0x12c] ss:$16 sps:$4 sm:$0xff]   ;;  %v285_v52 = vrot.slane %v4082_v45, %v284_v47 }
 0x162   :  { %v1404_v0 = vpop.f32.mrf.mxu0  ;;  %v3819_v58 = vld [vmem:[#allocation4 + $0x10c] ss:$16 sps:$4 sm:$0xff]  }
 0x163   :  { %v1446_v2 = vadd.f32 %v1445_v59, %v1403_v63  ;;  %v1405_v3 = vadd.f32 %v1404_v0, %v1362_v62  ;;  %v1623_v8 = vmax.f32 %v1444_v1, 0.0  ;;  %v3817_v1 = vld [vmem:[#allocation4 + $0x108] ss:$16 sps:$4 sm:$0xff]  }
 0x165   :  { %v1448_v6 = vadd.f32 %v1447_v4, %v1405_v3  ;;  %v1626_v7 = vmax.f32 %v1446_v2, 0.0  ;;  %v1484_v41 = vpop.f32.mrf.mxu1 }
 0x166   :  { %v1485_v60 = vadd.f32 %v1484_v41, %v285_v52  ;;  %v3879_v41 = vld [vmem:[%s4224_s5 + $0x28] sm:$0xff]  }
 0x167   :  { %v1627_v9 = vmax.f32 %v1448_v6, 0.0  ;;  %v4090_v15 = vpack.c.bf16 %v1626_v7, %v1622_v10  ;;  %v1486_v23 = vpop.f32.mrf.mxu1 }
 0x168   :  { %v1487_v59 = vadd.f32 %v1486_v23, %v289_v44  ;;  %v3838_v23 = vld [vmem:[#allocation4 + $0x268] ss:$16 sps:$4 sm:$0xff]  }
 0x169   :  { %v1631_v11 = vpack.c.bf16 %v1627_v9, %v1623_v8  ;;  %v1488_v49 = vpop.f32.mrf.mxu1 }
 0x16a   :  { %v1489_v63 = vadd.f32 %v1488_v49, %v285_v52  ;;  %v3844_v49 = vld [vmem:[#allocation4 + $0x228] ss:$16 sps:$4 sm:$0xff]  }
 0x16b   :  { %2456 = vmatprep.mubr.bf16.mxu0 %v1631_v11  ;;  %v1490_v56 = vpop.f32.mrf.mxu1  ;;  %v3850_v52 = vld [vmem:[#allocation4 + $0x3e8] ss:$16 sps:$4 sm:$0xff]  }
 0x16c   :  { %2457 = vmatmul.mubr.bf16.vlgmr.msra.gmra.mxu0 %v4090_v15  ;;  %v1491_v45 = vadd.f32 %v1490_v56, %v289_v44  ;;  %v3852_v44 = vld [vmem:[#allocation4 + $0x3ec] ss:$16 sps:$4 sm:$0xff]  }
 0x16d   :  { %2511 = vmatpush1.bf16.msra.mxu0 %v3730_v14  ;;  %2542 = vmatprep.mubr.bf16.mxu0 %v1631_v11  ;;  %v3858_v56 = vld [vmem:[#allocation4 + $0x3ac] ss:$16 sps:$4 sm:$0xff]  }
 0x16e   :  { %2512 = vmatprep.subr.bf16.mxu0 %v3735_v16 }
 0x171   :  { %2513 = vmatpush1.bf16.msra.mxu0 %v3733_v17 }
 0x172   :  { %2514 = vmatprep.subr.bf16.mxu0 %v3741_v18 }
 0x175   :  { %2515 = vmatpush1.bf16.msra.mxu0 %v3739_v19 }
 0x176   :  { %2516 = vmatprep.subr.bf16.mxu0 %v3747_v20 }
 0x179   :  { %2517 = vmatpush1.bf16.msra.mxu0 %v3745_v22 }
 0x17a   :  { %2518 = vmatprep.subr.bf16.mxu0 %v3753_v24 }
 0x17d   :  { %2519 = vmatpush1.bf16.msra.mxu0 %v3751_v25 }
 0x17e   :  { %2520 = vmatprep.subr.bf16.mxu0 %v3759_v27 }
 0x181   :  { %2521 = vmatpush1.bf16.msra.mxu0 %v3757_v28 }
 0x182   :  { %2522 = vmatprep.subr.bf16.mxu0 %v3765_v29 }
 0x185   :  { %2523 = vmatpush1.bf16.msra.mxu0 %v3763_v30  ;;  %v3826_v30 = vld [vmem:[#allocation4 + $0x2e8] ss:$16 sps:$4 sm:$0xff]  }
 0x186   :  { %2524 = vmatprep.subr.bf16.mxu0 %v3771_v31 }
 0x189   :  { %2525 = vmatpush1.bf16.msra.mxu0 %v3769_v32  ;;  %v3831_v32 = vld [vmem:[#allocation4 + $0x2cc] ss:$16 sps:$4 sm:$0xff]  }
 0x18a   :  { %2526 = vmatprep.subr.bf16.mxu0 %v3777_v33  ;;  %v3874_v33 = vld [vmem:[%s4224_s5 + $0x78] sm:$0xff]  }
 0x18d   :  { %2527 = vmatpush2.bf16.msra.mxu0 %v3775_v34  ;;  %v3875_v34 = vld [vmem:[%s4224_s5 + $0x38] sm:$0xff]  }
 0x18e   :  { %2528 = vmatprep.subr.bf16.mxu0 %v3783_v35  ;;  %v3829_v35 = vld [vmem:[#allocation4 + $0x2c8] ss:$16 sps:$4 sm:$0xff]  }
 0x191   :  { %2529 = vmatpush2.bf16.msra.mxu0 %v3781_v36  ;;  %v3834_v36 = vld [vmem:[#allocation4 + $0x2ac] ss:$16 sps:$4 sm:$0xff]  }
 0x192   :  { %2530 = vmatprep.subr.bf16.mxu0 %v3789_v37  ;;  %v3877_v37 = vld [vmem:[%s4224_s5 + $0x30] sm:$0xff]  }
 0x195   :  { %2531 = vmatpush2.bf16.msra.mxu0 %v3787_v38  ;;  %v3878_v38 = vld [vmem:[%s4224_s5 + $0x68] sm:$0xff]  }
 0x196   :  { %2532 = vmatprep.subr.bf16.mxu0 %v3795_v39  ;;  %v3832_v39 = vld [vmem:[#allocation4 + $0x2a8] ss:$16 sps:$4 sm:$0xff]  }
 0x199   :  { %2533 = vmatpush2.bf16.msra.mxu0 %v3793_v13  ;;  %v3837_v13 = vld [vmem:[#allocation4 + $0x28c] ss:$16 sps:$4 sm:$0xff]  }
 0x19a   :  { %2534 = vmatprep.subr.bf16.mxu0 %v3801_v43  ;;  %v3835_v43 = vld [vmem:[#allocation4 + $0x288] ss:$16 sps:$4 sm:$0xff]  }
 0x19c   :  { %v1527_v12 = vpop.f32.mrf.mxu0 }
 0x19d   :  { %2535 = vmatpush2.bf16.msra.mxu0 %v3799_v26  ;;  %v1528_v2 = vadd.f32 %v1527_v12, %v1485_v60  ;;  %v3840_v26 = vld [vmem:[#allocation4 + $0x26c] ss:$16 sps:$4 sm:$0xff]   ;;  %v3841_v12 = vld [vmem:[#allocation4 + $0x248] ss:$16 sps:$4 sm:$0xff]  }
 0x19e   :  { %v1529_v50 = vpop.f32.mrf.mxu0  ;;  %2536 = vmatprep.subr.bf16.mxu0 %v3807_v54  ;;  %v3843_v54 = vld [vmem:[#allocation4 + $0x24c] ss:$16 sps:$4 sm:$0xff]  }
 0x19f   :  { %v1530_v0 = vadd.f32 %v1529_v50, %v1487_v59  ;;  %v3849_v50 = vld [vmem:[#allocation4 + $0x20c] ss:$16 sps:$4 sm:$0xff]   ;;  %v3859_v59 = vld [vmem:[#allocation4 + $0x388] ss:$16 sps:$4 sm:$0xff]  }
 0x1a0   :  { %v1531_v53 = vpop.f32.mrf.mxu0  ;;  %v3864_v60 = vld [vmem:[#allocation4 + $0x36c] ss:$16 sps:$4 sm:$0xff]  }
 0x1a1   :  { %2537 = vmatpush2.bf16.msra.mxu0 %v3805_v48  ;;  %v1532_v5 = vadd.f32 %v1531_v53, %v1489_v63  ;;  %v3846_v48 = vld [vmem:[#allocation4 + $0x22c] ss:$16 sps:$4 sm:$0xff]   ;;  %v3865_v63 = vld [vmem:[#allocation4 + $0x348] ss:$16 sps:$4 sm:$0xff]  }
 0x1a2   :  { %v1533_v57 = vpop.f32.mrf.mxu0  ;;  %2538 = vmatprep.subr.bf16.mxu0 %v3813_v51  ;;  %v3847_v51 = vld [vmem:[#allocation4 + $0x208] ss:$16 sps:$4 sm:$0xff]   ;;  %v3855_v53 = vld [vmem:[#allocation4 + $0x3cc] ss:$16 sps:$4 sm:$0xff]  }
 0x1a3   :  { %v1534_v10 = vadd.f32 %v1533_v57, %v1491_v45  ;;  %v3856_v57 = vld [vmem:[#allocation4 + $0x3a8] ss:$16 sps:$4 sm:$0xff]   ;;  %v3881_v45 = vld [vmem:[%s4224_s5 + $0x20] sm:$0xff]  }
 0x1a4   :  { %v1613_v62 = vpop.f32.mrf.mxu0 }
 0x1a5   :  { %v1570_v61 = vpop.f32.mrf.mxu1  ;;  %2539 = vmatpush2.bf16.msra.mxu0 %v3811_v55  ;;  %v3853_v55 = vld [vmem:[#allocation4 + $0x3c8] ss:$16 sps:$4 sm:$0xff]  }
 0x1a6   :  { %v1615_v4 = vpop.f32.mrf.mxu0  ;;  %2540 = vmatprep.subr.bf16.mxu0 %v3819_v58  ;;  %v1571_v7 = vadd.f32 %v1570_v61, %v1528_v2  ;;  %v3861_v58 = vld [vmem:[#allocation4 + $0x38c] ss:$16 sps:$4 sm:$0xff]   ;;  %v3862_v61 = vld [vmem:[#allocation4 + $0x368] ss:$16 sps:$4 sm:$0xff]  }
 0x1a7   :  { %v1572_v3 = vpop.f32.mrf.mxu1  ;;  %v3873_v2 = vld [vmem:[#allocation4 + $0x30c] ss:$16 sps:$4 sm:$0xff]  }
 0x1a8   :  { %v1573_v6 = vadd.f32 %v1572_v3, %v1530_v0  ;;  %v1617_v9 = vpop.f32.mrf.mxu0  ;;  %v1614_v20 = vadd.f32 %v1613_v62, %v1571_v7  ;;  %v3867_v62 = vld [vmem:[#allocation4 + $0x34c] ss:$16 sps:$4 sm:$0xff]   ;;  %v3871_v3 = vld [vmem:[#allocation4 + $0x308] ss:$16 sps:$4 sm:$0xff]   ;;  %v3884_v7 = vld [vmem:[%s4224_s5 + $0x50] sm:$0xff]  }
 0x1a9   :  { %v1574_v8 = vpop.f32.mrf.mxu1  ;;  %2541 = vmatpush2.bf16.msra.mxu0 %v3817_v1  ;;  %v3870_v0 = vld [vmem:[#allocation4 + $0x32c] ss:$16 sps:$4 sm:$0xff]   ;;  %v3868_v1 = vld [vmem:[#allocation4 + $0x328] ss:$16 sps:$4 sm:$0xff]  }
 0x1aa   :  { %v1575_v11 = vadd.f32 %v1574_v8, %v1532_v5  ;;  %v1619_v16 = vpop.f32.mrf.mxu0  ;;  %v1616_v17 = vadd.f32 %v1615_v4, %v1573_v6  ;;  %v1624_v28 = vmax.f32 %v1614_v20, 0.0  ;;  %3339 = vmatprep.subr.bf16.mxu0 %v3874_v33  ;;  %v3880_v4 = vld [vmem:[%s4224_s5 + $0x60] sm:$0xff]   ;;  %v3882_v5 = vld [vmem:[%s4224_s5 + $0x58] sm:$0xff]   ;;  %v3885_v8 = vld [vmem:[%s4224_s5 + $0x10] sm:$0xff]  }
 0x1ab   :  { %v1576_v14 = vpop.f32.mrf.mxu1  ;;  %v3883_v6 = vld [vmem:[%s4224_s5 + $0x18] sm:$0xff]   ;;  %v3894_v20 = vld [vmem:[%s4224_s5 + $0xe8] sm:$0xff]   ;;  %v3904_v33 = vld [vmem:[%s4224_s5 + $0xc0] sm:$0xff]  }
 0x1ac   :  { %v1618_v18 = vadd.f32 %v1617_v9, %v1575_v11  ;;  %v1577_v19 = vadd.f32 %v1576_v14, %v1534_v10  ;;  %2543 = vmatmul.mubr.bf16.vlgmr.msra.gmra.mxu0 %v4090_v15  ;;  %v1625_v25 = vmax.f32 %v1616_v17, 0.0  ;;  %v3876_v15 = vld [vmem:[%s4224_s5 + $0x70] sm:$0xff]   ;;  %v3886_v9 = vld [vmem:[%s4224_s5 + $0x48] sm:$0xff]   ;;  %v3888_v11 = vld [vmem:[%s4224_s5 + $0x40] sm:$0xff]  }
 0x1ad   :  { %3340 = vmatpush3.bf16.msra.mxu0 %v3875_v34  ;;  %v3887_v10 = vld [vmem:[%s4224_s5 + $0x8] sm:$0xff]   ;;  %v3889_v14 = vld [vmem:[%s4224_s5] sm:$0xff]   ;;  %v3891_v17 = vld [vmem:[%s4224_s5 + $0xb8] sm:$0xff]  }
 0x1ae   :  { %v1620_v22 = vadd.f32 %v1619_v16, %v1577_v19  ;;  %v1628_v24 = vmax.f32 %v1618_v18, 0.0  ;;  %3341 = vmatprep.subr.bf16.mxu0 %v3876_v15  ;;  %v3890_v16 = vld [vmem:[%s4224_s5 + $0xf8] sm:$0xff]   ;;  %v3892_v18 = vld [vmem:[%s4224_s5 + $0xf0] sm:$0xff]   ;;  %v3905_v34 = vld [vmem:[%s4224_s5 + $0x80] sm:$0xff]  }
 0x1af   :  { %v3893_v19 = vld [vmem:[%s4224_s5 + $0xb0] sm:$0xff]  }
 0x1b0   :  { %v1629_v27 = vmax.f32 %v1620_v22, 0.0  ;;  %v4102_v31 = vpack.c.bf16 %v1628_v24, %v1624_v28  ;;  %v3895_v22 = vld [vmem:[%s4224_s5 + $0xa8] sm:$0xff]   ;;  %v3896_v24 = vld [vmem:[%s4224_s5 + $0xe0] sm:$0xff]   ;;  %v3899_v28 = vld [vmem:[%s4224_s5 + $0x98] sm:$0xff]  }
 0x1b1   :  { %3342 = vmatpush3.bf16.msra.mxu0 %v3877_v37 }
 0x1b2   :  { %v1633_v29 = vpack.c.bf16 %v1629_v27, %v1625_v25  ;;  %3343 = vmatprep.subr.bf16.mxu0 %v3878_v38  ;;  %v3897_v25 = vld [vmem:[%s4224_s5 + $0xa0] sm:$0xff]   ;;  %v3898_v27 = vld [vmem:[%s4224_s5 + $0xd8] sm:$0xff]  }
 0x1b4   :  { %2499 = vmatprep.mubr.bf16.mxu1 %v1633_v29 }
 0x1b5   :  { %2500 = vmatmul.mubr.bf16.vlgmr.msra.gmra.mxu1 %v4102_v31  ;;  %3344 = vmatpush3.bf16.msra.mxu0 %v3879_v41 }
 0x1b6   :  { %2554 = vmatpush1.bf16.msra.mxu1 %v3826_v30  ;;  %2585 = vmatprep.mubr.bf16.mxu1 %v1633_v29  ;;  %v3900_v29 = vld [vmem:[%s4224_s5 + $0xd0] sm:$0xff]  }
 0x1b7   :  { %2555 = vmatprep.subr.bf16.mxu1 %v3831_v32  ;;  %3345 = vmatprep.subr.bf16.mxu0 %v3880_v4  ;;  %v3901_v30 = vld [vmem:[%s4224_s5 + $0x90] sm:$0xff]   ;;  %v3903_v32 = vld [vmem:[%s4224_s5 + $0x88] sm:$0xff]  }
 0x1b9   :  { %3346 = vmatpush3.bf16.msra.mxu0 %v3881_v45 }
 0x1ba   :  { %2556 = vmatpush1.bf16.msra.mxu1 %v3829_v35  ;;  %3347 = vmatprep.subr.bf16.mxu0 %v3882_v5 }
 0x1bb   :  { %2557 = vmatprep.subr.bf16.mxu1 %v3834_v36  ;;  %v1762_v36 = vld [vmem:[%s4223_s4] sm:$0xf] }
 0x1bc   :  { %v1771_v38 = vrot.slane %v1762_v36, %v280_v21 }
 0x1bd   :  { %3348 = vmatpush3.bf16.msra.mxu0 %v3883_v6 }
 0x1be   :  { %2558 = vmatpush1.bf16.msra.mxu1 %v3832_v39  ;;  %3349 = vmatprep.subr.bf16.mxu0 %v3884_v7  ;;  %v1767_v39 = vrot.slane %v1762_v36, %v276_v42 }
 0x1bf   :  { %2559 = vmatprep.subr.bf16.mxu1 %v3837_v13 }
 0x1c1   :  { %3350 = vmatpush3.bf16.msra.mxu0 %v3885_v8 }
 0x1c2   :  { %2560 = vmatpush1.bf16.msra.mxu1 %v3835_v43  ;;  %3351 = vmatprep.subr.bf16.mxu0 %v3886_v9 }
 0x1c3   :  { %2561 = vmatprep.subr.bf16.mxu1 %v3840_v26 }
 0x1c5   :  { %3352 = vmatpush3.bf16.msra.mxu0 %v3887_v10 }
 0x1c6   :  { %2562 = vmatpush1.bf16.msra.mxu1 %v3838_v23  ;;  %3353 = vmatprep.subr.bf16.mxu0 %v3888_v11 }
 0x1c7   :  { %2563 = vmatprep.subr.bf16.mxu1 %v3843_v54 }
 0x1c9   :  { %3354 = vmatpush3.bf16.msra.mxu0 %v3889_v14 }
 0x1ca   :  { %2564 = vmatpush1.bf16.msra.mxu1 %v3841_v12 }
 0x1cb   :  { %2565 = vmatprep.subr.bf16.mxu1 %v3846_v48 }
 0x1ce   :  { %2566 = vmatpush1.bf16.msra.mxu1 %v3844_v49 }
 0x1cf   :  { %2567 = vmatprep.subr.bf16.mxu1 %v3849_v50 }
 0x1d2   :  { %2568 = vmatpush1.bf16.msra.mxu1 %v3847_v51 }
 0x1d3   :  { %2569 = vmatprep.subr.bf16.mxu1 %v3852_v44 }
 0x1d6   :  { %2570 = vmatpush2.bf16.msra.mxu1 %v3850_v52 }
 0x1d7   :  { %2571 = vmatprep.subr.bf16.mxu1 %v3855_v53 }
 0x1da   :  { %2572 = vmatpush2.bf16.msra.mxu1 %v3853_v55 }
 0x1db   :  { %2573 = vmatprep.subr.bf16.mxu1 %v3858_v56 }
 0x1de   :  { %2574 = vmatpush2.bf16.msra.mxu1 %v3856_v57 }
 0x1df   :  { %2575 = vmatprep.subr.bf16.mxu1 %v3861_v58 }
 0x1e2   :  { %2576 = vmatpush2.bf16.msra.mxu1 %v3859_v59 }
 0x1e3   :  { %2577 = vmatprep.subr.bf16.mxu1 %v3864_v60 }
 0x1e6   :  { %2578 = vmatpush2.bf16.msra.mxu1 %v3862_v61  ;;  %v1779_v61 = vrot.slane %v1762_v36, %v288_v46 }
 0x1e7   :  { %2579 = vmatprep.subr.bf16.mxu1 %v3867_v62  ;;  %v1775_v62 = vrot.slane %v1762_v36, %v284_v47 }
 0x1ea   :  { %2580 = vmatpush2.bf16.msra.mxu1 %v3865_v63 }
 0x1eb   :  { %2581 = vmatprep.subr.bf16.mxu1 %v3870_v0 }
 0x1ee   :  { %2582 = vmatpush2.bf16.msra.mxu1 %v3868_v1 }
 0x1ef   :  { %2583 = vmatprep.subr.bf16.mxu1 %v3873_v2 }
 0x1f2   :  { %2584 = vmatpush2.bf16.msra.mxu1 %v3871_v3 }
 0x1f3   :  { %3361 = vmatprep.subr.bf16.mxu1 %v3890_v16 }
 0x1f5   :  { %2586 = vmatmul.mubr.bf16.vlgmr.msra.gmra.mxu1 %v4102_v31  ;;  %v3902_v31 = vld [vmem:[%s4224_s5 + $0xc8] sm:$0xff]  }
 0x1f6   :  { %3362 = vmatpush3.bf16.msra.mxu1 %v3891_v17 }
 0x1f7   :  { %3363 = vmatprep.subr.bf16.mxu1 %v3892_v18 }
 0x1fa   :  { %3364 = vmatpush3.bf16.msra.mxu1 %v3893_v19 }
 0x1fb   :  { %3365 = vmatprep.subr.bf16.mxu1 %v3894_v20 }
 0x1fe   :  { %3366 = vmatpush3.bf16.msra.mxu1 %v3895_v22 }
 0x1ff   :  { %3367 = vmatprep.subr.bf16.mxu1 %v3896_v24 }
 0x202   :  { %3368 = vmatpush3.bf16.msra.mxu1 %v3897_v25  ;;  %v3297_v25 = vld [vmem:[%s4225_s6] ss:$0 sm:$0xff] }
 0x203   :  { %3369 = vmatprep.subr.bf16.mxu1 %v3898_v27 }
 0x206   :  { %3370 = vmatpush3.bf16.msra.mxu1 %v3899_v28 }
 0x207   :  { %3371 = vmatprep.subr.bf16.mxu1 %v3900_v29 }
 0x20a   :  { %3372 = vmatpush3.bf16.msra.mxu1 %v3901_v30 }
 0x20b   :  { %3373 = vmatprep.subr.bf16.mxu1 %v3902_v31 }
 0x20e   :  { %3374 = vmatpush3.bf16.msra.mxu1 %v3903_v32 }
 0x20f   :  { %3375 = vmatprep.subr.bf16.mxu1 %v3904_v33 }
 0x212   :  { %3376 = vmatpush3.bf16.msra.mxu1 %v3905_v34 }
 0x22c   :  { %v2458_v15 = vpop.f32.mrf.mxu0 }
 0x22d   :  { %v2459_v54 = vadd.f32 %v2458_v15, %v1767_v39 }
 0x22e   :  { %v2460_v35 = vpop.f32.mrf.mxu0 }
 0x22f   :  { %v2461_v26 = vadd.f32 %v2460_v35, %v1771_v38 }
 0x230   :  { %v2462_v37 = vpop.f32.mrf.mxu0 }
 0x231   :  { %v2463_v23 = vadd.f32 %v2462_v37, %v1767_v39 }
 0x232   :  { %v2464_v41 = vpop.f32.mrf.mxu0 }
 0x233   :  { %v2465_v48 = vadd.f32 %v2464_v41, %v1771_v38 }
 0x26c   :  { %v2544_v42 = vpop.f32.mrf.mxu0 }
 0x26d   :  { %v2545_v4 = vadd.f32 %v2544_v42, %v1775_v62 }
 0x26e   :  { %v2546_v59 = vpop.f32.mrf.mxu0 }
 0x26f   :  { %v2547_v2 = vadd.f32 %v2546_v59, %v1779_v61 }
 0x270   :  { %v2548_v60 = vpop.f32.mrf.mxu0 }
 0x271   :  { %v2549_v3 = vadd.f32 %v2548_v60, %v1775_v62 }
 0x272   :  { %v2550_v0 = vpop.f32.mrf.mxu0 }
 0x273   :  { %v2551_v5 = vadd.f32 %v2550_v0, %v1779_v61 }
 0x275   :  { %v2501_v13 = vpop.f32.mrf.mxu1 }
 0x276   :  { %v2502_v51 = vadd.f32 %v2501_v13, %v2459_v54 }
 0x277   :  { %v2503_v43 = vpop.f32.mrf.mxu1 }
 0x278   :  { %v2504_v49 = vadd.f32 %v2503_v43, %v2461_v26  ;;  %v2596_v21 = vmax.f32 %v2502_v51, 0.0 }
 0x279   :  { %v2505_v12 = vpop.f32.mrf.mxu1 }
 0x27a   :  { %v2506_v50 = vadd.f32 %v2505_v12, %v2463_v23  ;;  %v2597_v55 = vmax.f32 %v2504_v49, 0.0 }
 0x27b   :  { %v2507_v44 = vpop.f32.mrf.mxu1 }
 0x27c   :  { %v2508_v52 = vadd.f32 %v2507_v44, %v2465_v48  ;;  %v2600_v53 = vmax.f32 %v2506_v50, 0.0 }
 0x27e   :  { %v2601_v56 = vmax.f32 %v2508_v52, 0.0  ;;  %v2604_v58 = vpack.c.bf16 %v2600_v53, %v2596_v21 }
 0x280   :  { %v2605_v57 = vpack.c.bf16 %v2601_v56, %v2597_v55 }
 0x282   :  { %2903 = vmatprep.mubr.bf16.mxu0 %v2605_v57 }
 0x283   :  { %2904 = vmatmul.mubr.bf16.vlgmr.msra.gmra.mxu0 %v2604_v58 }
 0x2b5   :  { %v2587_v63 = vpop.f32.mrf.mxu1 }
 0x2b6   :  { %v2588_v8 = vadd.f32 %v2587_v63, %v2545_v4 }
 0x2b7   :  { %v2589_v1 = vpop.f32.mrf.mxu1 }
 0x2b8   :  { %v2590_v6 = vadd.f32 %v2589_v1, %v2547_v2  ;;  %v2598_v46 = vmax.f32 %v2588_v8, 0.0 }
 0x2b9   :  { %v2591_v45 = vpop.f32.mrf.mxu1 }
 0x2ba   :  { %v2592_v7 = vadd.f32 %v2591_v45, %v2549_v3  ;;  %v2599_v14 = vmax.f32 %v2590_v6, 0.0 }
 0x2bb   :  { %v2593_v9 = vpop.f32.mrf.mxu1 }
 0x2bc   :  { %v2594_v10 = vadd.f32 %v2593_v9, %v2551_v5  ;;  %v2602_v11 = vmax.f32 %v2592_v7, 0.0 }
 0x2be   :  { %v2603_v16 = vmax.f32 %v2594_v10, 0.0  ;;  %v2606_v40 = vpack.c.bf16 %v2602_v11, %v2598_v46 }
 0x2c0   :  { %v2607_v17 = vpack.c.bf16 %v2603_v16, %v2599_v14 }
 0x2c2   :  { %2944 = vmatprep.mubr.bf16.mxu1 %v2607_v17 }
 0x2c3   :  { %2945 = vmatmul.mubr.bf16.vlgmr.msra.gmra.mxu1 %v2606_v40 }
 0x343   :  { %v3355_v47 = vpop.f32.mrf.mxu0 }
 0x345   :  { %v3356_v18 = vpop.f32.mrf.mxu0 }
 0x346   :  { %v3357_v24 = vadd.f32 %v3356_v18, %v3355_v47 }
 0x347   :  { %v3358_v19 = vpop.f32.mrf.mxu0 }
 0x348   :  { %v2906_v31 = vadd.f32 %v3357_v24, %v3297_v25 }
 0x349   :  { %v3359_v20 = vpop.f32.mrf.mxu0 }
 0x34a   :  { %v3360_v28 = vadd.f32 %v3359_v20, %v3358_v19 }
 0x34c   :  { %v2909_v33 = vadd.f32 %v3360_v28, %v3297_v25 }
 0x383   :  { %v3377_v22 = vpop.f32.mrf.mxu1 }
 0x385   :  { %v3378_v27 = vpop.f32.mrf.mxu1 }
 0x386   :  { %v3379_v29 = vadd.f32 %v3378_v27, %v3377_v22 }
 0x387   :  { %v3380_v30 = vpop.f32.mrf.mxu1 }
 0x388   :  { %v2947_v34 = vadd.f32 %v3379_v29, %v2906_v31 }
 0x389   :  { %v3381_v32 = vpop.f32.mrf.mxu1 }
 0x38a   :  { %v3382_v15 = vadd.f32 %v3381_v32, %v3380_v30  ;;  %v2953_v36 = vmax.f32 %v2947_v34, 0.0 }
 0x38c   :  { %v2950_v35 = vadd.f32 %v3382_v15, %v2909_v33 }
 0x38e   :  { %v2954_v37 = vmax.f32 %v2950_v35, 0.0 }
 0x390   :  { %v3337_v38 = vpack.c.bf16 %v2954_v37, %v2953_v36 }
 0x392   :  { %3338 = vst [vmem:[%s4226_s7] sm:$0xff] %v3337_v38  }
 0x393   :  { %2969 = vsyncpa [#allocation3], 1 }
 0x394   :  { %2970 = vsyncpa [#allocation5], 1 }

</bundles_post_ra>
